<compile_context>
chip_gen: v6e
topology: v6e:2x2x1
jax: 0.10.0
libtpu: 0.0.40
codegen_flags: <defaults>
</compile_context>

<pallas_src>
import math
import functools

import jax
import jax.numpy as jnp
from jax import lax
from jax.experimental import pallas as pl
from jax.experimental.pallas import tpu as pltpu


# ----------------------------------------------------------------------------
# Kernel
# ----------------------------------------------------------------------------

def _layer_norm(x, gamma, beta, eps=1e-5):
    mean = jnp.mean(x, axis=-1, keepdims=True)
    var = jnp.mean((x - mean) ** 2, axis=-1, keepdims=True)
    return (x - mean) * lax.rsqrt(var + eps) * gamma + beta


def encoder_kernel(x_ref, pe_ref,
                   wqkv_ref, bqkv_ref, wo_ref, bo_ref,
                   g1_ref, be1_ref,
                   w1_ref, b1_ref, w2_ref, b2_ref,
                   g2_ref, be2_ref,
                   out_ref, *, num_heads):
    """One grid step = one (batch tile, layer) pair.

    The output BlockSpec index depends only on the batch axis, so `out_ref`
    is the VMEM-resident running activation across the inner (layer) grid
    axis; the pipeline double-buffers next-layer weights behind compute.
    """
    layer = pl.program_id(1)

    # Layer 0: fuse embedding + positional encoding (dropout == identity).
    @pl.when(layer == 0)
    def _():
        out_ref[...] = x_ref[...] + pe_ref[...]

    x3d = out_ref[...]                                  # (BT, S, D) f32
    BT, S, D = x3d.shape
    H = num_heads
    dk = D // H
    M = BT * S
    scale = 1.0 / math.sqrt(dk)

    x = x3d.reshape(M, D)                               # leading-dim merge only
    x_bf = x.astype(jnp.bfloat16)

    # ---- fused QKV projection: one (M, D) @ (D, 3D) MXU matmul ----
    qkv = (jnp.dot(x_bf, wqkv_ref[0], preferred_element_type=jnp.float32)
           + bqkv_ref[0]).astype(jnp.bfloat16)
    q = qkv[:, :D]
    k = qkv[:, D:2 * D]
    v = qkv[:, 2 * D:]

    # ---- batched multi-head attention -------------------------------------
    # Head split uses static lane slices + leading-dim reshapes only
    # (no minor-dim reshape / relayout); batch index is h*BT + b.
    def split_heads(t):                                 # (M, D) -> (H*BT, S, dk)
        return jnp.concatenate(
            [t[:, h * dk:(h + 1) * dk].reshape(BT, S, dk) for h in range(H)],
            axis=0)

    qh = split_heads(q)
    kh = split_heads(k)
    vh = split_heads(v)

    # scores: (H*BT, S, S) -- single batched dot_general (K transposed once).
    scores = lax.dot_general(qh, kh, (((2,), (2,)), ((0,), (0,))),
                             preferred_element_type=jnp.float32) * scale
    scores = scores - jnp.max(scores, axis=-1, keepdims=True)
    p = jnp.exp(scores)
    p = p * pl.reciprocal(jnp.sum(p, axis=-1, keepdims=True), approx=True)

    # ctx: (H*BT, S, dk) -- single batched dot_general.
    ctx = lax.dot_general(p.astype(jnp.bfloat16), vh,
                          (((2,), (1,)), ((0,), (0,))),
                          preferred_element_type=jnp.float32)

    # Merge heads back to a lane-dense (M, D) bf16 slab for the Wo matmul.
    ctx2 = jnp.concatenate(
        [ctx[h * BT:(h + 1) * BT].reshape(M, dk) for h in range(H)],
        axis=-1).astype(jnp.bfloat16)

    attn = jnp.dot(ctx2, wo_ref[0],
                   preferred_element_type=jnp.float32) + bo_ref[0]

    # ---- residual + LayerNorm 1 ----
    x1 = _layer_norm(x + attn, g1_ref[0], be1_ref[0])

    # ---- feed forward: Linear -> ReLU -> Linear ----
    h1 = jnp.dot(x1.astype(jnp.bfloat16), w1_ref[0],
                 preferred_element_type=jnp.float32) + b1_ref[0]
    h1 = jnp.maximum(h1, 0.0)
    ff = jnp.dot(h1.astype(jnp.bfloat16), w2_ref[0],
                 preferred_element_type=jnp.float32) + b2_ref[0]

    # ---- residual + LayerNorm 2 -> running activation (and final output) ----
    y = _layer_norm(x1 + ff, g2_ref[0], be2_ref[0])
    out_ref[...] = y.reshape(BT, S, D)


# ----------------------------------------------------------------------------
# Pallas wrapper
# ----------------------------------------------------------------------------

def _pick_b_tile(B, S, D, budget_bytes=8 << 20):
    """Largest batch tile that divides B, keeps the activation block small,
    and (when possible) leaves >= 2 grid steps on the parallel axis for
    megacore / v7x 2-TC occupancy."""
    divs = [d for d in range(1, B + 1)
            if B % d == 0 and d * S * D * 4 <= budget_bytes]
    pref = [d for d in divs if B // d >= 2]
    if pref:
        return max(pref)
    return max(divs) if divs else 1


def _vmem_limit_bytes():
    # Derive from physical capacity; leave ~16 MiB headroom for compiler
    # internal scratch (v7x has only 64 MiB physical per TensorCore).
    try:
        cap = pltpu.get_tpu_info().vmem_capacity_bytes
    except Exception:
        cap = 64 * 1024 * 1024
    return max(32 * 1024 * 1024, cap - 16 * 1024 * 1024)


def encoder_forward(tokens, emb_table, pe, stacked, num_heads, b_tile=None):
    B, S = tokens.shape
    D = emb_table.shape[1]
    L = stacked["wqkv"].shape[0]
    if b_tile is None:
        b_tile = _pick_b_tile(B, S, D)
    assert B % b_tile == 0

    # Embedding gather stays as XLA glue (data-dependent gather).
    emb = jnp.take(emb_table, tokens, axis=0)           # (B, S, D) f32
    pe_slice = pe[:S, :]

    names = ["wqkv", "bqkv", "wo", "bo", "g1", "be1",
             "w1", "b1", "w2", "b2", "g2", "be2"]
    weights = [stacked[n] for n in names]
    w_specs = [pl.BlockSpec((1,) + tuple(w.shape[1:]), lambda b, l: (l, 0, 0))
               for w in weights]

    kernel = functools.partial(encoder_kernel, num_heads=num_heads)
    return pl.pallas_call(
        kernel,
        out_shape=jax.ShapeDtypeStruct((B, S, D), jnp.float32),
        grid=(B // b_tile, L),
        in_specs=[pl.BlockSpec((b_tile, S, D), lambda b, l: (b, 0, 0)),
                  pl.BlockSpec((S, D), lambda b, l: (0, 0))] + w_specs,
        out_specs=pl.BlockSpec((b_tile, S, D), lambda b, l: (b, 0, 0)),
        compiler_params=pltpu.CompilerParams(
            dimension_semantics=("parallel", "arbitrary"),
            vmem_limit_bytes=_vmem_limit_bytes()),
    )(emb, pe_slice, *weights)


# ----------------------------------------------------------------------------
# Parameter construction (mimics nn.Module init shapes)
# ----------------------------------------------------------------------------

def make_positional_encoding(max_seq_length, d_model):
    pos = jnp.arange(max_seq_length, dtype=jnp.float32)[:, None]
    i = jnp.arange(0, d_model, 2, dtype=jnp.float32)[None, :]
    div = jnp.exp(-i * (math.log(10000.0) / d_model))
    pe = jnp.zeros((max_seq_length, d_model), jnp.float32)
    pe = pe.at[:, 0::2].set(jnp.sin(pos * div))
    pe = pe.at[:, 1::2].set(jnp.cos(pos * div))
    return pe


def init_linear(key, fan_in, fan_out):
    kw, kb = jax.random.split(key)
    bound = 1.0 / math.sqrt(fan_in)
    w = jax.random.uniform(kw, (fan_in, fan_out), jnp.float32, -bound, bound)
    b = jax.random.uniform(kb, (1, fan_out), jnp.float32, -bound, bound)
    return w, b


def _bf16_round(w):
    # Kernel feeds bf16 into the MXU; round weights once so the pure-JAX
    # reference sees identical quantized weights.
    return w.astype(jnp.bfloat16).astype(jnp.float32)


def init_layer_params(key, d_model, d_ff):
    keys = jax.random.split(key, 6)
    wq, bq = init_linear(keys[0], d_model, d_model)
    wk, bk = init_linear(keys[1], d_model, d_model)
    wv, bv = init_linear(keys[2], d_model, d_model)
    wo, bo = init_linear(keys[3], d_model, d_model)
    w1, b1 = init_linear(keys[4], d_model, d_ff)
    w2, b2 = init_linear(keys[5], d_ff, d_model)
    wq, wk, wv, wo, w1, w2 = map(_bf16_round, (wq, wk, wv, wo, w1, w2))
    ones = jnp.ones((1, d_model), jnp.float32)
    zeros = jnp.zeros((1, d_model), jnp.float32)
    return dict(wq=wq, bq=bq, wk=wk, bk=bk, wv=wv, bv=bv, wo=wo, bo=bo,
                g1=ones, be1=zeros, w1=w1, b1=b1, w2=w2, b2=b2,
                g2=ones, be2=zeros)


def stack_layer_params(layer_params):
    def stack(fn, dtype):
        return jnp.stack([fn(p) for p in layer_params], axis=0).astype(dtype)
    return dict(
        wqkv=stack(lambda p: jnp.concatenate([p["wq"], p["wk"], p["wv"]], 1),
                   jnp.bfloat16),
        bqkv=stack(lambda p: jnp.concatenate([p["bq"], p["bk"], p["bv"]], 1),
                   jnp.float32),
        wo=stack(lambda p: p["wo"], jnp.bfloat16),
        bo=stack(lambda p: p["bo"], jnp.float32),
        g1=stack(lambda p: p["g1"], jnp.float32),
        be1=stack(lambda p: p["be1"], jnp.float32),
        w1=stack(lambda p: p["w1"], jnp.bfloat16),
        b1=stack(lambda p: p["b1"], jnp.float32),
        w2=stack(lambda p: p["w2"], jnp.bfloat16),
        b2=stack(lambda p: p["b2"], jnp.float32),
        g2=stack(lambda p: p["g2"], jnp.float32),
        be2=stack(lambda p: p["be2"], jnp.float32),
    )


# ----------------------------------------------------------------------------
# Pure-JAX f32 reference (same math) for a sanity check
# ----------------------------------------------------------------------------

def reference_forward(tokens, emb_table, pe, layer_params, num_heads):
    B, S = tokens.shape
    x = jnp.take(emb_table, tokens, axis=0) + pe[:S, :][None]
    for p in layer_params:
        D = x.shape[-1]
        dk = D // num_heads
        q = x @ p["wq"] + p["bq"]
        k = x @ p["wk"] + p["bk"]
        v = x @ p["wv"] + p["bv"]
        q = q.reshape(B, S, num_heads, dk).transpose(0, 2, 1, 3)
        k = k.reshape(B, S, num_heads, dk).transpose(0, 2, 1, 3)
        v = v.reshape(B, S, num_heads, dk).transpose(0, 2, 1, 3)
        s = jnp.einsum("bhqd,bhkd->bhqk", q, k) / math.sqrt(dk)
        a = jax.nn.softmax(s, axis=-1)
        ctx = jnp.einsum("bhqk,bhkd->bhqd", a, v).transpose(0, 2, 1, 3)
        ctx = ctx.reshape(B, S, D)
        attn = ctx @ p["wo"] + p["bo"]

        def ln(z, g, b):
            m = z.mean(-1, keepdims=True)
            vv = ((z - m) ** 2).mean(-1, keepdims=True)
            return (z - m) / jnp.sqrt(vv + 1e-5) * g + b

        x = ln(x + attn, p["g1"], p["be1"])
        ff = jnp.maximum(x @ p["w1"] + p["b1"], 0.0) @ p["w2"] + p["b2"]
        x = ln(x + ff, p["g2"], p["be2"])
    return x


# ----------------------------------------------------------------------------

if __name__ == "__main__":
    vocab_size = 50
    d_model = 128          # lane-aligned (multiple of 128)
    num_heads = 4
    num_layers = 2
    d_ff = 256
    max_seq_length = 16
    B, S = 4, 8            # b_tile auto -> 2, so the parallel axis has 2 steps

    root = jax.random.PRNGKey(0)
    k_emb, k_tok, *k_layers = jax.random.split(root, 2 + num_layers)

    emb_table = jax.random.normal(k_emb, (vocab_size, d_model), jnp.float32)
    pe = make_positional_encoding(max_seq_length, d_model)
    layer_params = [init_layer_params(k, d_model, d_ff) for k in k_layers]
    stacked = stack_layer_params(layer_params)

    tokens = jax.random.randint(k_tok, (B, S), 0, vocab_size, dtype=jnp.int32)

    out = encoder_forward(tokens, emb_table, pe, stacked, num_heads)
    out = jax.block_until_ready(out)

    ref = reference_forward(tokens, emb_table, pe, layer_params, num_heads)
    assert out.shape == (B, S, d_model)
    # bf16 matmul inputs + approx reciprocal -> looser tolerance than pure f32.
    assert jnp.allclose(out, ref, atol=5e-2, rtol=5e-2), "mismatch vs reference"

    print("KERNEL_OK")
</pallas_src>

<mosaic_0001>
module attributes {stable_mosaic.version = 11 : i64} {
  func.func @encoder_kernel(%arg0: i32, %arg1: i32, %arg2: memref<2x8x128xf32, #tpu.memory_space<vmem>>, %arg3: memref<8x128xf32, #tpu.memory_space<vmem>>, %arg4: memref<1x128x384xbf16, #tpu.memory_space<vmem>>, %arg5: memref<1x1x384xf32, #tpu.memory_space<vmem>>, %arg6: memref<1x128x128xbf16, #tpu.memory_space<vmem>>, %arg7: memref<1x1x128xf32, #tpu.memory_space<vmem>>, %arg8: memref<1x1x128xf32, #tpu.memory_space<vmem>>, %arg9: memref<1x1x128xf32, #tpu.memory_space<vmem>>, %arg10: memref<1x128x256xbf16, #tpu.memory_space<vmem>>, %arg11: memref<1x1x256xf32, #tpu.memory_space<vmem>>, %arg12: memref<1x256x128xbf16, #tpu.memory_space<vmem>>, %arg13: memref<1x1x128xf32, #tpu.memory_space<vmem>>, %arg14: memref<1x1x128xf32, #tpu.memory_space<vmem>>, %arg15: memref<1x1x128xf32, #tpu.memory_space<vmem>>, %arg16: memref<2x8x128xf32, #tpu.memory_space<vmem>>) attributes {dimension_semantics = [#tpu.dimension_semantics<parallel>, #tpu.dimension_semantics<arbitrary>], iteration_bounds = array<i64: 2, 2>, scalar_prefetch = 0 : i64, scratch_operands = 0 : i64, tpu.core_type = #tpu.core_type<tc>, window_params = [{transform_indices = @transform_0, window_bounds = array<i64: 2, 8, 128>}, {pipeline_mode = #tpu.pipeline_mode<synchronous>, transform_indices = @transform_1, window_bounds = array<i64: 8, 128>}, {transform_indices = @transform_2, window_bounds = array<i64: 1, 128, 384>}, {transform_indices = @transform_3, window_bounds = array<i64: 1, 1, 384>}, {transform_indices = @transform_4, window_bounds = array<i64: 1, 128, 128>}, {transform_indices = @transform_5, window_bounds = array<i64: 1, 1, 128>}, {transform_indices = @transform_6, window_bounds = array<i64: 1, 1, 128>}, {transform_indices = @transform_7, window_bounds = array<i64: 1, 1, 128>}, {transform_indices = @transform_8, window_bounds = array<i64: 1, 128, 256>}, {transform_indices = @transform_9, window_bounds = array<i64: 1, 1, 256>}, {transform_indices = @transform_10, window_bounds = array<i64: 1, 256, 128>}, {transform_indices = @transform_11, window_bounds = array<i64: 1, 1, 128>}, {transform_indices = @transform_12, window_bounds = array<i64: 1, 1, 128>}, {transform_indices = @transform_13, window_bounds = array<i64: 1, 1, 128>}, {transform_indices = @transform_14, window_bounds = array<i64: 2, 8, 128>}]} {
    %c0_i32 = arith.constant 0 : i32
    %0 = arith.cmpi eq, %arg1, %c0_i32 : i32
    %1 = arith.extui %0 : i1 to i32
    %c0_i32_0 = arith.constant 0 : i32
    %2 = arith.cmpi ne, %1, %c0_i32_0 : i32
    scf.if %2 {
      %c0_61 = arith.constant 0 : index
      %c0_62 = arith.constant 0 : index
      %c0_63 = arith.constant 0 : index
      %150 = vector.load %arg2[%c0_61, %c0_62, %c0_63] : memref<2x8x128xf32, #tpu.memory_space<vmem>>, vector<2x8x128xf32>
      %c0_64 = arith.constant 0 : index
      %c0_65 = arith.constant 0 : index
      %151 = vector.load %arg3[%c0_64, %c0_65] : memref<8x128xf32, #tpu.memory_space<vmem>>, vector<8x128xf32>
      %152 = vector.shape_cast %151 : vector<8x128xf32> to vector<1x8x128xf32>
      %153 = vector.broadcast %152 : vector<1x8x128xf32> to vector<2x8x128xf32>
      %154 = arith.addf %150, %153 : vector<2x8x128xf32>
      %c0_66 = arith.constant 0 : index
      %c0_67 = arith.constant 0 : index
      %c0_68 = arith.constant 0 : index
      %155 = vector.load %arg16[%c0_66, %c0_67, %c0_68] : memref<2x8x128xf32, #tpu.memory_space<vmem>>, vector<2x8x128xf32>
      tpu.vector_store %arg16[%c0_66, %c0_67, %c0_68], %154 {strides = array<i32>} : memref<2x8x128xf32, #tpu.memory_space<vmem>>, vector<2x8x128xf32>,
    } else {
    }
    %c0 = arith.constant 0 : index
    %c0_1 = arith.constant 0 : index
    %c0_2 = arith.constant 0 : index
    %3 = vector.load %arg16[%c0, %c0_1, %c0_2] : memref<2x8x128xf32, #tpu.memory_space<vmem>>, vector<2x8x128xf32>
    %4 = vector.shape_cast %3 : vector<2x8x128xf32> to vector<16x128xf32>
    %5 = arith.truncf %4 : vector<16x128xf32> to vector<16x128xbf16>
    %c0_3 = arith.constant 0 : index
    %c0_4 = arith.constant 0 : index
    %c0_5 = arith.constant 0 : index
    %6 = vector.load %arg4[%c0_3, %c0_4, %c0_5] : memref<1x128x384xbf16, #tpu.memory_space<vmem>>, vector<1x128x384xbf16>
    %7 = vector.shape_cast %6 : vector<1x128x384xbf16> to vector<128x384xbf16>
    %cst = arith.constant dense<0.000000e+00> : vector<16x384xf32>
    %8 = tpu.matmul %5, %7, %cst {dimension_numbers = #tpu.dot_dimension_numbers<[1], [0], [0], [1], [0, 0, 1, 1], [], []>} : vector<16x128xbf16>, vector<128x384xbf16>, vector<16x384xf32> -> vector<16x384xf32>
    %c0_6 = arith.constant 0 : index
    %c0_7 = arith.constant 0 : index
    %c0_8 = arith.constant 0 : index
    %9 = vector.load %arg5[%c0_6, %c0_7, %c0_8] : memref<1x1x384xf32, #tpu.memory_space<vmem>>, vector<1x1x384xf32>
    %10 = vector.shape_cast %9 : vector<1x1x384xf32> to vector<1x384xf32>
    %11 = vector.broadcast %10 : vector<1x384xf32> to vector<16x384xf32>
    %12 = arith.addf %8, %11 : vector<16x384xf32>
    %13 = arith.truncf %12 : vector<16x384xf32> to vector<16x384xbf16>
    %14 = vector.extract_strided_slice %13 {offsets = [0, 0], sizes = [16, 128], strides = [1, 1]} : vector<16x384xbf16> to vector<16x128xbf16>
    %15 = vector.extract_strided_slice %13 {offsets = [0, 128], sizes = [16, 128], strides = [1, 1]} : vector<16x384xbf16> to vector<16x128xbf16>
    %16 = vector.extract_strided_slice %13 {offsets = [0, 256], sizes = [16, 128], strides = [1, 1]} : vector<16x384xbf16> to vector<16x128xbf16>
    %17 = vector.extract_strided_slice %14 {offsets = [0, 0], sizes = [16, 32], strides = [1, 1]} : vector<16x128xbf16> to vector<16x32xbf16>
    %18 = vector.shape_cast %17 : vector<16x32xbf16> to vector<2x8x32xbf16>
    %19 = vector.extract_strided_slice %14 {offsets = [0, 32], sizes = [16, 32], strides = [1, 1]} : vector<16x128xbf16> to vector<16x32xbf16>
    %20 = vector.shape_cast %19 : vector<16x32xbf16> to vector<2x8x32xbf16>
    %21 = vector.extract_strided_slice %14 {offsets = [0, 64], sizes = [16, 32], strides = [1, 1]} : vector<16x128xbf16> to vector<16x32xbf16>
    %22 = vector.shape_cast %21 : vector<16x32xbf16> to vector<2x8x32xbf16>
    %23 = vector.extract_strided_slice %14 {offsets = [0, 96], sizes = [16, 32], strides = [1, 1]} : vector<16x128xbf16> to vector<16x32xbf16>
    %24 = vector.shape_cast %23 : vector<16x32xbf16> to vector<2x8x32xbf16>
    %25 = tpu.concatenate %18, %20, %22, %24 in 0 : vector<2x8x32xbf16>, vector<2x8x32xbf16>, vector<2x8x32xbf16>, vector<2x8x32xbf16> -> vector<8x8x32xbf16>
    %26 = vector.extract_strided_slice %15 {offsets = [0, 0], sizes = [16, 32], strides = [1, 1]} : vector<16x128xbf16> to vector<16x32xbf16>
    %27 = vector.shape_cast %26 : vector<16x32xbf16> to vector<2x8x32xbf16>
    %28 = vector.extract_strided_slice %15 {offsets = [0, 32], sizes = [16, 32], strides = [1, 1]} : vector<16x128xbf16> to vector<16x32xbf16>
    %29 = vector.shape_cast %28 : vector<16x32xbf16> to vector<2x8x32xbf16>
    %30 = vector.extract_strided_slice %15 {offsets = [0, 64], sizes = [16, 32], strides = [1, 1]} : vector<16x128xbf16> to vector<16x32xbf16>
    %31 = vector.shape_cast %30 : vector<16x32xbf16> to vector<2x8x32xbf16>
    %32 = vector.extract_strided_slice %15 {offsets = [0, 96], sizes = [16, 32], strides = [1, 1]} : vector<16x128xbf16> to vector<16x32xbf16>
    %33 = vector.shape_cast %32 : vector<16x32xbf16> to vector<2x8x32xbf16>
    %34 = tpu.concatenate %27, %29, %31, %33 in 0 : vector<2x8x32xbf16>, vector<2x8x32xbf16>, vector<2x8x32xbf16>, vector<2x8x32xbf16> -> vector<8x8x32xbf16>
    %35 = vector.extract_strided_slice %16 {offsets = [0, 0], sizes = [16, 32], strides = [1, 1]} : vector<16x128xbf16> to vector<16x32xbf16>
    %36 = vector.shape_cast %35 : vector<16x32xbf16> to vector<2x8x32xbf16>
    %37 = vector.extract_strided_slice %16 {offsets = [0, 32], sizes = [16, 32], strides = [1, 1]} : vector<16x128xbf16> to vector<16x32xbf16>
    %38 = vector.shape_cast %37 : vector<16x32xbf16> to vector<2x8x32xbf16>
    %39 = vector.extract_strided_slice %16 {offsets = [0, 64], sizes = [16, 32], strides = [1, 1]} : vector<16x128xbf16> to vector<16x32xbf16>
    %40 = vector.shape_cast %39 : vector<16x32xbf16> to vector<2x8x32xbf16>
    %41 = vector.extract_strided_slice %16 {offsets = [0, 96], sizes = [16, 32], strides = [1, 1]} : vector<16x128xbf16> to vector<16x32xbf16>
    %42 = vector.shape_cast %41 : vector<16x32xbf16> to vector<2x8x32xbf16>
    %43 = tpu.concatenate %36, %38, %40, %42 in 0 : vector<2x8x32xbf16>, vector<2x8x32xbf16>, vector<2x8x32xbf16>, vector<2x8x32xbf16> -> vector<8x8x32xbf16>
    %cst_9 = arith.constant dense<0.000000e+00> : vector<8x8x8xf32>
    %44 = tpu.matmul %25, %34, %cst_9 {dimension_numbers = #tpu.dot_dimension_numbers<[2], [2], [1], [1], [0, 0, 0, 1, 1, 1], [0], [0]>} : vector<8x8x32xbf16>, vector<8x8x32xbf16>, vector<8x8x8xf32> -> vector<8x8x8xf32>
    %cst_10 = arith.constant 0.176776692 : f32
    %45 = vector.broadcast %cst_10 : f32 to vector<8x8x8xf32>
    %46 = arith.mulf %44, %45 : vector<8x8x8xf32>
    %cst_11 = arith.constant dense<0xFF800000> : vector<8x8xf32>
    %47 = vector.multi_reduction <maximumf>, %46, %cst_11 [2] : vector<8x8x8xf32> to vector<8x8xf32>
    %48 = vector.shape_cast %47 : vector<8x8xf32> to vector<8x8x1xf32>
    %49 = vector.broadcast %48 : vector<8x8x1xf32> to vector<8x8x8xf32>
    %50 = arith.subf %46, %49 : vector<8x8x8xf32>
    %51 = math.exp %50 : vector<8x8x8xf32>
    %cst_12 = arith.constant dense<0.000000e+00> : vector<8x8xf32>
    %52 = vector.multi_reduction <add>, %51, %cst_12 [2] : vector<8x8x8xf32> to vector<8x8xf32>
    %53 = vector.shape_cast %52 : vector<8x8xf32> to vector<8x8x1xf32>
    %54 = tpu.reciprocal %53 {approx = true} : vector<8x8x1xf32> -> vector<8x8x1xf32>
    %55 = vector.broadcast %54 : vector<8x8x1xf32> to vector<8x8x8xf32>
    %56 = arith.mulf %51, %55 : vector<8x8x8xf32>
    %57 = arith.truncf %56 : vector<8x8x8xf32> to vector<8x8x8xbf16>
    %cst_13 = arith.constant dense<0.000000e+00> : vector<8x8x32xf32>
    %58 = tpu.matmul %57, %43, %cst_13 {dimension_numbers = #tpu.dot_dimension_numbers<[2], [1], [1], [2], [0, 0, 0, 1, 1, 2], [0], [0]>} : vector<8x8x8xbf16>, vector<8x8x32xbf16>, vector<8x8x32xf32> -> vector<8x8x32xf32>
    %59 = vector.extract_strided_slice %58 {offsets = [0, 0, 0], sizes = [2, 8, 32], strides = [1, 1, 1]} : vector<8x8x32xf32> to vector<2x8x32xf32>
    %60 = vector.shape_cast %59 : vector<2x8x32xf32> to vector<16x32xf32>
    %61 = vector.extract_strided_slice %58 {offsets = [2, 0, 0], sizes = [2, 8, 32], strides = [1, 1, 1]} : vector<8x8x32xf32> to vector<2x8x32xf32>
    %62 = vector.shape_cast %61 : vector<2x8x32xf32> to vector<16x32xf32>
    %63 = vector.extract_strided_slice %58 {offsets = [4, 0, 0], sizes = [2, 8, 32], strides = [1, 1, 1]} : vector<8x8x32xf32> to vector<2x8x32xf32>
    %64 = vector.shape_cast %63 : vector<2x8x32xf32> to vector<16x32xf32>
    %65 = vector.extract_strided_slice %58 {offsets = [6, 0, 0], sizes = [2, 8, 32], strides = [1, 1, 1]} : vector<8x8x32xf32> to vector<2x8x32xf32>
    %66 = vector.shape_cast %65 : vector<2x8x32xf32> to vector<16x32xf32>
    %67 = tpu.concatenate %60, %62, %64, %66 in 1 : vector<16x32xf32>, vector<16x32xf32>, vector<16x32xf32>, vector<16x32xf32> -> vector<16x128xf32>
    %68 = arith.truncf %67 : vector<16x128xf32> to vector<16x128xbf16>
    %c0_14 = arith.constant 0 : index
    %c0_15 = arith.constant 0 : index
    %c0_16 = arith.constant 0 : index
    %69 = vector.load %arg6[%c0_14, %c0_15, %c0_16] : memref<1x128x128xbf16, #tpu.memory_space<vmem>>, vector<1x128x128xbf16>
    %70 = vector.shape_cast %69 : vector<1x128x128xbf16> to vector<128x128xbf16>
    %cst_17 = arith.constant dense<0.000000e+00> : vector<16x128xf32>
    %71 = tpu.matmul %68, %70, %cst_17 {dimension_numbers = #tpu.dot_dimension_numbers<[1], [0], [0], [1], [0, 0, 1, 1], [], []>} : vector<16x128xbf16>, vector<128x128xbf16>, vector<16x128xf32> -> vector<16x128xf32>
    %c0_18 = arith.constant 0 : index
    %c0_19 = arith.constant 0 : index
    %c0_20 = arith.constant 0 : index
    %72 = vector.load %arg7[%c0_18, %c0_19, %c0_20] : memref<1x1x128xf32, #tpu.memory_space<vmem>>, vector<1x1x128xf32>
    %73 = vector.shape_cast %72 : vector<1x1x128xf32> to vector<1x128xf32>
    %74 = vector.broadcast %73 : vector<1x128xf32> to vector<16x128xf32>
    %75 = arith.addf %71, %74 : vector<16x128xf32>
    %76 = arith.addf %4, %75 : vector<16x128xf32>
    %c0_21 = arith.constant 0 : index
    %c0_22 = arith.constant 0 : index
    %c0_23 = arith.constant 0 : index
    %77 = vector.load %arg8[%c0_21, %c0_22, %c0_23] : memref<1x1x128xf32, #tpu.memory_space<vmem>>, vector<1x1x128xf32>
    %78 = vector.shape_cast %77 : vector<1x1x128xf32> to vector<1x128xf32>
    %c0_24 = arith.constant 0 : index
    %c0_25 = arith.constant 0 : index
    %c0_26 = arith.constant 0 : index
    %79 = vector.load %arg9[%c0_24, %c0_25, %c0_26] : memref<1x1x128xf32, #tpu.memory_space<vmem>>, vector<1x1x128xf32>
    %80 = vector.shape_cast %79 : vector<1x1x128xf32> to vector<1x128xf32>
    %cst_27 = arith.constant dense<0.000000e+00> : vector<16xf32>
    %81 = vector.multi_reduction <add>, %76, %cst_27 [1] : vector<16x128xf32> to vector<16xf32>
    %82 = vector.shape_cast %81 : vector<16xf32> to vector<16x1xf32>
    %cst_28 = arith.constant 1.280000e+02 : f32
    %83 = vector.broadcast %cst_28 : f32 to vector<16x1xf32>
    %84 = arith.divf %82, %83 : vector<16x1xf32>
    %85 = vector.broadcast %84 : vector<16x1xf32> to vector<16x128xf32>
    %86 = arith.subf %76, %85 : vector<16x128xf32>
    %87 = arith.mulf %86, %86 : vector<16x128xf32>
    %cst_29 = arith.constant dense<0.000000e+00> : vector<16xf32>
    %88 = vector.multi_reduction <add>, %87, %cst_29 [1] : vector<16x128xf32> to vector<16xf32>
    %89 = vector.shape_cast %88 : vector<16xf32> to vector<16x1xf32>
    %cst_30 = arith.constant 1.280000e+02 : f32
    %90 = vector.broadcast %cst_30 : f32 to vector<16x1xf32>
    %91 = arith.divf %89, %90 : vector<16x1xf32>
    %92 = vector.broadcast %84 : vector<16x1xf32> to vector<16x128xf32>
    %93 = arith.subf %76, %92 : vector<16x128xf32>
    %cst_31 = arith.constant 9.99999974E-6 : f32
    %94 = vector.broadcast %cst_31 : f32 to vector<16x1xf32>
    %95 = arith.addf %91, %94 : vector<16x1xf32>
    %96 = math.rsqrt %95 : vector<16x1xf32>
    %97 = vector.broadcast %96 : vector<16x1xf32> to vector<16x128xf32>
    %98 = arith.mulf %93, %97 : vector<16x128xf32>
    %99 = vector.broadcast %78 : vector<1x128xf32> to vector<16x128xf32>
    %100 = arith.mulf %98, %99 : vector<16x128xf32>
    %101 = vector.broadcast %80 : vector<1x128xf32> to vector<16x128xf32>
    %102 = arith.addf %100, %101 : vector<16x128xf32>
    %103 = arith.truncf %102 : vector<16x128xf32> to vector<16x128xbf16>
    %c0_32 = arith.constant 0 : index
    %c0_33 = arith.constant 0 : index
    %c0_34 = arith.constant 0 : index
    %104 = vector.load %arg10[%c0_32, %c0_33, %c0_34] : memref<1x128x256xbf16, #tpu.memory_space<vmem>>, vector<1x128x256xbf16>
    %105 = vector.shape_cast %104 : vector<1x128x256xbf16> to vector<128x256xbf16>
    %cst_35 = arith.constant dense<0.000000e+00> : vector<16x256xf32>
    %106 = tpu.matmul %103, %105, %cst_35 {dimension_numbers = #tpu.dot_dimension_numbers<[1], [0], [0], [1], [0, 0, 1, 1], [], []>} : vector<16x128xbf16>, vector<128x256xbf16>, vector<16x256xf32> -> vector<16x256xf32>
    %c0_36 = arith.constant 0 : index
    %c0_37 = arith.constant 0 : index
    %c0_38 = arith.constant 0 : index
    %107 = vector.load %arg11[%c0_36, %c0_37, %c0_38] : memref<1x1x256xf32, #tpu.memory_space<vmem>>, vector<1x1x256xf32>
    %108 = vector.shape_cast %107 : vector<1x1x256xf32> to vector<1x256xf32>
    %109 = vector.broadcast %108 : vector<1x256xf32> to vector<16x256xf32>
    %110 = arith.addf %106, %109 : vector<16x256xf32>
    %cst_39 = arith.constant 0.000000e+00 : f32
    %111 = vector.broadcast %cst_39 : f32 to vector<16x256xf32>
    %112 = arith.maximumf %110, %111 : vector<16x256xf32>
    %113 = arith.truncf %112 : vector<16x256xf32> to vector<16x256xbf16>
    %c0_40 = arith.constant 0 : index
    %c0_41 = arith.constant 0 : index
    %c0_42 = arith.constant 0 : index
    %114 = vector.load %arg12[%c0_40, %c0_41, %c0_42] : memref<1x256x128xbf16, #tpu.memory_space<vmem>>, vector<1x256x128xbf16>
    %115 = vector.shape_cast %114 : vector<1x256x128xbf16> to vector<256x128xbf16>
    %cst_43 = arith.constant dense<0.000000e+00> : vector<16x128xf32>
    %116 = tpu.matmul %113, %115, %cst_43 {dimension_numbers = #tpu.dot_dimension_numbers<[1], [0], [0], [1], [0, 0, 1, 1], [], []>} : vector<16x256xbf16>, vector<256x128xbf16>, vector<16x128xf32> -> vector<16x128xf32>
    %c0_44 = arith.constant 0 : index
    %c0_45 = arith.constant 0 : index
    %c0_46 = arith.constant 0 : index
    %117 = vector.load %arg13[%c0_44, %c0_45, %c0_46] : memref<1x1x128xf32, #tpu.memory_space<vmem>>, vector<1x1x128xf32>
    %118 = vector.shape_cast %117 : vector<1x1x128xf32> to vector<1x128xf32>
    %119 = vector.broadcast %118 : vector<1x128xf32> to vector<16x128xf32>
    %120 = arith.addf %116, %119 : vector<16x128xf32>
    %121 = arith.addf %102, %120 : vector<16x128xf32>
    %c0_47 = arith.constant 0 : index
    %c0_48 = arith.constant 0 : index
    %c0_49 = arith.constant 0 : index
    %122 = vector.load %arg14[%c0_47, %c0_48, %c0_49] : memref<1x1x128xf32, #tpu.memory_space<vmem>>, vector<1x1x128xf32>
    %123 = vector.shape_cast %122 : vector<1x1x128xf32> to vector<1x128xf32>
    %c0_50 = arith.constant 0 : index
    %c0_51 = arith.constant 0 : index
    %c0_52 = arith.constant 0 : index
    %124 = vector.load %arg15[%c0_50, %c0_51, %c0_52] : memref<1x1x128xf32, #tpu.memory_space<vmem>>, vector<1x1x128xf32>
    %125 = vector.shape_cast %124 : vector<1x1x128xf32> to vector<1x128xf32>
    %cst_53 = arith.constant dense<0.000000e+00> : vector<16xf32>
    %126 = vector.multi_reduction <add>, %121, %cst_53 [1] : vector<16x128xf32> to vector<16xf32>
    %127 = vector.shape_cast %126 : vector<16xf32> to vector<16x1xf32>
    %cst_54 = arith.constant 1.280000e+02 : f32
    %128 = vector.broadcast %cst_54 : f32 to vector<16x1xf32>
    %129 = arith.divf %127, %128 : vector<16x1xf32>
    %130 = vector.broadcast %129 : vector<16x1xf32> to vector<16x128xf32>
    %131 = arith.subf %121, %130 : vector<16x128xf32>
    %132 = arith.mulf %131, %131 : vector<16x128xf32>
    %cst_55 = arith.constant dense<0.000000e+00> : vector<16xf32>
    %133 = vector.multi_reduction <add>, %132, %cst_55 [1] : vector<16x128xf32> to vector<16xf32>
    %134 = vector.shape_cast %133 : vector<16xf32> to vector<16x1xf32>
    %cst_56 = arith.constant 1.280000e+02 : f32
    %135 = vector.broadcast %cst_56 : f32 to vector<16x1xf32>
    %136 = arith.divf %134, %135 : vector<16x1xf32>
    %137 = vector.broadcast %129 : vector<16x1xf32> to vector<16x128xf32>
    %138 = arith.subf %121, %137 : vector<16x128xf32>
    %cst_57 = arith.constant 9.99999974E-6 : f32
    %139 = vector.broadcast %cst_57 : f32 to vector<16x1xf32>
    %140 = arith.addf %136, %139 : vector<16x1xf32>
    %141 = math.rsqrt %140 : vector<16x1xf32>
    %142 = vector.broadcast %141 : vector<16x1xf32> to vector<16x128xf32>
    %143 = arith.mulf %138, %142 : vector<16x128xf32>
    %144 = vector.broadcast %123 : vector<1x128xf32> to vector<16x128xf32>
    %145 = arith.mulf %143, %144 : vector<16x128xf32>
    %146 = vector.broadcast %125 : vector<1x128xf32> to vector<16x128xf32>
    %147 = arith.addf %145, %146 : vector<16x128xf32>
    %148 = vector.shape_cast %147 : vector<16x128xf32> to vector<2x8x128xf32>
    %c0_58 = arith.constant 0 : index
    %c0_59 = arith.constant 0 : index
    %c0_60 = arith.constant 0 : index
    %149 = vector.load %arg16[%c0_58, %c0_59, %c0_60] : memref<2x8x128xf32, #tpu.memory_space<vmem>>, vector<2x8x128xf32>
    tpu.vector_store %arg16[%c0_58, %c0_59, %c0_60], %148 {strides = array<i32>} : memref<2x8x128xf32, #tpu.memory_space<vmem>>, vector<2x8x128xf32>,
    return
  }
  func.func @transform_0(%arg0: i32, %arg1: i32) -> (i32, i32, i32) {
    %c0_i32 = arith.constant 0 : i32
    %c0_i32_0 = arith.constant 0 : i32
    %c0_i32_1 = arith.constant 0 : i32
    return %arg0, %c0_i32, %c0_i32_0 : i32, i32, i32
  }
  func.func @transform_1(%arg0: i32, %arg1: i32) -> (i32, i32) {
    %c0_i32 = arith.constant 0 : i32
    %c0_i32_0 = arith.constant 0 : i32
    %c0_i32_1 = arith.constant 0 : i32
    return %c0_i32, %c0_i32_0 : i32, i32
  }
  func.func @transform_2(%arg0: i32, %arg1: i32) -> (i32, i32, i32) {
    %c0_i32 = arith.constant 0 : i32
    %c0_i32_0 = arith.constant 0 : i32
    %c0_i32_1 = arith.constant 0 : i32
    return %arg1, %c0_i32, %c0_i32_0 : i32, i32, i32
  }
  func.func @transform_3(%arg0: i32, %arg1: i32) -> (i32, i32, i32) {
    %c0_i32 = arith.constant 0 : i32
    %c0_i32_0 = arith.constant 0 : i32
    %c0_i32_1 = arith.constant 0 : i32
    return %arg1, %c0_i32, %c0_i32_0 : i32, i32, i32
  }
  func.func @transform_4(%arg0: i32, %arg1: i32) -> (i32, i32, i32) {
    %c0_i32 = arith.constant 0 : i32
    %c0_i32_0 = arith.constant 0 : i32
    %c0_i32_1 = arith.constant 0 : i32
    return %arg1, %c0_i32, %c0_i32_0 : i32, i32, i32
  }
  func.func @transform_5(%arg0: i32, %arg1: i32) -> (i32, i32, i32) {
    %c0_i32 = arith.constant 0 : i32
    %c0_i32_0 = arith.constant 0 : i32
    %c0_i32_1 = arith.constant 0 : i32
    return %arg1, %c0_i32, %c0_i32_0 : i32, i32, i32
  }
  func.func @transform_6(%arg0: i32, %arg1: i32) -> (i32, i32, i32) {
    %c0_i32 = arith.constant 0 : i32
    %c0_i32_0 = arith.constant 0 : i32
    %c0_i32_1 = arith.constant 0 : i32
    return %arg1, %c0_i32, %c0_i32_0 : i32, i32, i32
  }
  func.func @transform_7(%arg0: i32, %arg1: i32) -> (i32, i32, i32) {
    %c0_i32 = arith.constant 0 : i32
    %c0_i32_0 = arith.constant 0 : i32
    %c0_i32_1 = arith.constant 0 : i32
    return %arg1, %c0_i32, %c0_i32_0 : i32, i32, i32
  }
  func.func @transform_8(%arg0: i32, %arg1: i32) -> (i32, i32, i32) {
    %c0_i32 = arith.constant 0 : i32
    %c0_i32_0 = arith.constant 0 : i32
    %c0_i32_1 = arith.constant 0 : i32
    return %arg1, %c0_i32, %c0_i32_0 : i32, i32, i32
  }
  func.func @transform_9(%arg0: i32, %arg1: i32) -> (i32, i32, i32) {
    %c0_i32 = arith.constant 0 : i32
    %c0_i32_0 = arith.constant 0 : i32
    %c0_i32_1 = arith.constant 0 : i32
    return %arg1, %c0_i32, %c0_i32_0 : i32, i32, i32
  }
  func.func @transform_10(%arg0: i32, %arg1: i32) -> (i32, i32, i32) {
    %c0_i32 = arith.constant 0 : i32
    %c0_i32_0 = arith.constant 0 : i32
    %c0_i32_1 = arith.constant 0 : i32
    return %arg1, %c0_i32, %c0_i32_0 : i32, i32, i32
  }
  func.func @transform_11(%arg0: i32, %arg1: i32) -> (i32, i32, i32) {
    %c0_i32 = arith.constant 0 : i32
    %c0_i32_0 = arith.constant 0 : i32
    %c0_i32_1 = arith.constant 0 : i32
    return %arg1, %c0_i32, %c0_i32_0 : i32, i32, i32
  }
  func.func @transform_12(%arg0: i32, %arg1: i32) -> (i32, i32, i32) {
    %c0_i32 = arith.constant 0 : i32
    %c0_i32_0 = arith.constant 0 : i32
    %c0_i32_1 = arith.constant 0 : i32
    return %arg1, %c0_i32, %c0_i32_0 : i32, i32, i32
  }
  func.func @transform_13(%arg0: i32, %arg1: i32) -> (i32, i32, i32) {
    %c0_i32 = arith.constant 0 : i32
    %c0_i32_0 = arith.constant 0 : i32
    %c0_i32_1 = arith.constant 0 : i32
    return %arg1, %c0_i32, %c0_i32_0 : i32, i32, i32
  }
  func.func @transform_14(%arg0: i32, %arg1: i32) -> (i32, i32, i32) {
    %c0_i32 = arith.constant 0 : i32
    %c0_i32_0 = arith.constant 0 : i32
    %c0_i32_1 = arith.constant 0 : i32
    return %arg0, %c0_i32, %c0_i32_0 : i32, i32, i32
  }
}

</mosaic_0001>

<bundles_post_ra>
// kernel: tpu_custom_call.1
= control target key start
LH: loop header
LB: loop body
LE: loop exit
PB: predicated region body
PF: predicated region fallthrough
CT: control target
= control target key end

     0   :  { %s4604_s0 = inlined_call_operand.hbm [shape: f32[4,8,128], index: 0, kind: input, shape index: {}]   ;;  %s4605_s1 = inlined_call_operand.hbm [shape: f32[8,128], index: 1, kind: input, shape index: {}]   ;;  %s4606_s2 = inlined_call_operand.hbm [shape: bf16[2,128,384], index: 2, kind: input, shape index: {}]   ;;  %s4607_s3 = inlined_call_operand.hbm [shape: f32[2,1,384], index: 3, kind: input, shape index: {}]   ;;  %s4608_s4 = inlined_call_operand.hbm [shape: bf16[2,128,128], index: 4, kind: input, shape index: {}]   ;;  %s4609_s5 = inlined_call_operand.vmem [shape: f32[2,1,128], index: 5, kind: input, shape index: {}]   ;;  %s4610_s6 = inlined_call_operand.vmem [shape: f32[2,1,128], index: 6, kind: input, shape index: {}]   ;;  %s4611_s7 = inlined_call_operand.vmem [shape: f32[2,1,128], index: 7, kind: input, shape index: {}]   ;;  %s4612_s8 = inlined_call_operand.hbm [shape: bf16[2,128,256], index: 8, kind: input, shape index: {}]   ;;  %s4613_s9 = inlined_call_operand.vmem [shape: f32[2,1,256], index: 9, kind: input, shape index: {}]   ;;  %s4614_s10 = inlined_call_operand.hbm [shape: bf16[2,256,128], index: 10, kind: input, shape index: {}]   ;;  %s4615_s11 = inlined_call_operand.vmem [shape: f32[2,1,128], index: 11, kind: input, shape index: {}]   ;;  %s4616_s12 = inlined_call_operand.vmem [shape: f32[2,1,128], index: 12, kind: input, shape index: {}]   ;;  %s4617_s13 = inlined_call_operand.vmem [shape: f32[2,1,128], index: 13, kind: input, shape index: {}]   ;;  %s4618_s14 = inlined_call_operand.hbm [shape: f32[4,8,128], index: 14, kind: output, shape index: {}]  }
   0x1   :  { %4638 = sst [smem:[#allocation30_spill]] %s4604_s0 }
   0x2   :  { %4639 = sst [smem:[#allocation31_spill]] %s4605_s1 }
   0x3   :  { %4640 = sst [smem:[#allocation32_spill]] %s4606_s2 }
   0x4   :  { %4641 = sst [smem:[#allocation33_spill]] %s4607_s3 }
   0x5   :  { %4642 = sst [smem:[#allocation34_spill]] %s4608_s4 }
   0x6   :  { %4643 = sst [smem:[#allocation35_spill]] %s4609_s5 }
   0x7   :  { %4644 = sst [smem:[#allocation36_spill]] %s4610_s6 }
   0x8   :  { %4645 = sst [smem:[#allocation37_spill]] %s4611_s7 }
   0x9   :  { %4646 = sst [smem:[#allocation38_spill]] %s4612_s8 }
   0xa   :  { %4647 = sst [smem:[#allocation39_spill]] %s4613_s9 }
   0xb   :  { %4648 = sst [smem:[#allocation40_spill]] %s4614_s10 }
   0xc   :  { %4649 = sst [smem:[#allocation41_spill]] %s4615_s11 }
   0xd   :  { %4650 = sst [smem:[#allocation42_spill]] %s4616_s12 }
   0xe   :  { %4651 = sst [smem:[#allocation43_spill]] %s4617_s13 }
   0xf   :  { %4652 = sst [smem:[#allocation44_spill]] %s4618_s14 }
  0x10   :  { %19 = vsyncpa [#allocation3], 0 }
  0x11   :  { %21 = vsyncpa [#allocation3 + $0x1], 0 }
  0x12   :  { %22 = vsyncpa [#allocation6], 0 }
  0x13   :  { %23 = vsyncpa [#allocation4], 0 }
  0x14   :  { %25 = vsyncpa [#allocation4 + $0x1], 0  ;;  %s3868_s29 = smov 0   ;;  %s3870_s30 = smov 0  }
  0x15   :  { %s3872_s15 = smov 0   ;;  %s3874_s16 = smov 0  }
  0x16   :  { %s3876_s17 = smov 0   ;;  %s3878_s18 = smov 0  }
  0x17   :  { %s3880_s19 = smov 0   ;;  %s3882_s20 = smov 0  }
  0x18   :  { %s3884_s21 = smov 0   ;;  %s3886_s22 = smov 0  }
  0x19   :  { %s3888_s23 = smov 0  }
  0x1a LB: > { %4653 = sst [smem:[#allocation17_spill]] %s3733_s30  ;;  %s40_s24 = sadd.s32 1, %s3761_s21  ;;  %s3769_s23 = sphi %s3888_s23, %s31_s23   ;;  %s3765_s22 = sphi %s3886_s22, %s4725_s22   ;;  %s3761_s21 = sphi %s3884_s21, %s4724_s21   ;;  %s3757_s20 = sphi %s3882_s20, %s4723_s20   ;;  %s3753_s19 = sphi %s3880_s19, %s4722_s19   ;;  %s3749_s18 = sphi %s3878_s18, %s4721_s18   ;;  %s3745_s17 = sphi %s3876_s17, %s4727_s17   ;;  %s3741_s16 = sphi %s3874_s16, %s4726_s16   ;;  %s3737_s15 = sphi %s3872_s15, %s4719_s15   ;;  %s3733_s30 = sphi %s3870_s30, %s4718_s30   ;;  %s3729_s29 = sphi %s3868_s29, %s4717_s29  }
  0x1b   : > { %4654 = sst [smem:[#allocation18_spill]] %s3737_s15  ;;  %s43_s25 = sadd.s32 1, %s3765_s22 }
  0x1c   : > { %4655 = sst [smem:[#allocation19_spill]] %s3741_s16  ;;  %p41_p0 = scmp.ge.s32.totalorder %s40_s24, 2 }
  0x1d   : > { %4656 = sst [smem:[#allocation20_spill]] %s3749_s18  ;;  %s50_s26 = sadd.s32 1, %s3749_s18 }
  0x1e   : > { %4657 = sst [smem:[#allocation21_spill]] %s3753_s19  ;;  %p57_p1 = scmp.ne.s32.totalorder %s3749_s18, %s3745_s17 }
  0x1f   : > { %4658 = sst [smem:[#allocation22_spill]] %s3757_s20  ;;  %p58_p2 = scmp.eq.s32.totalorder %s3769_s23, 0 }
  0x20   : > { %4659 = sst [smem:[#allocation23_spill]] %s3761_s21  ;;  %s4729_s24 = smov (%p41_p0, %s40_s24), 0 }
  0x21   : > { %4660 = sst [smem:[#allocation24_spill]] %s3765_s22  ;;  %s4731_s25 = smov (!%p41_p0, %s43_s25), %s3765_s22 }
  0x22   : > { %4661 = sst [smem:[#allocation25_spill]] %s4729_s24  ;;  %p3937_p3 = por %p58_p2, %p57_p1 }
  0x23   : > { %s94_s28 = ssub.s32 %s3761_s21, %s4729_s24  ;;  %p45_p4 = scmp.ge.s32.totalorder %s4731_s25, 2 }
  0x24   : > { %p3943_p5 = scmp.eq.s32.totalorder %s94_s28, 0  ;;  %p3206_p6 = scmp.lt.s32.totalorder %s3769_s23, 4 }
  0x25   : > { %s4733_s25 = smov (%p45_p4, %s4731_s25), 0  ;;  %s457_s20 = sand.u32 1, %s3769_s23  }
  0x26   : > { %4664 = sst [smem:[#allocation26_spill]] %s4733_s25  ;;  %s459_s13 = sand.u32 1, %s3749_s18  }
  0x27   : > { %s47_s12 = ssub.s32 %s3765_s22, %s4733_s25  ;;  %s2815_s11 = sshll.u32 %s459_s13, 4 }
  0x28   : > { %p48_p7 = scmp.eq.s32.totalorder %s47_s12, 0  ;;  %s2935_s9 = sshll.u32 %s3765_s22, 8 }
  0x29   : > { %s4666_s0 = sld [smem:[#allocation30_spill]]  ;;  %s461_s28 = scalar_lea.vmem [#allocation2], %s2815_s11 }
  0x2a   : > { %s3956_s7 = scalar_select %p48_p7, %s3749_s18, %s50_s26  }
  0x2b   : > { %s468_s19 = sshll.u32 %s461_s28, 4  ;;  %p3965_p8 = pnand %p3206_p6, %p3937_p3  ;;  %s469_s19 = int_to_ptr.vmem [resolvable:$true] %s468_s19 }
  0x2c   : > { %4665 = sst [smem:[#allocation27_spill]] %s3956_s7  ;;  %s3969_s25 = scalar_lea.sflag [#allocation3], %s457_s20 }
  0x2d   : > { %p3449_p9 = pneg %p3965_p8  ;;  %s3460_s12 = scalar_lea.vmem %s469_s19, 256 }
  0x2e   : > { %p3461_p10 = scmp.ne.s32.totalorder %s469_s19, %s3460_s12  ;;  %s3771_s6 = smov [#allocation2]  }
  0x2f   : > { %s467_s5 = scalar_lea.hbm %s4666_s0, %s2935_s9  ;;  %s3465_s9 = sshll.u32 %s3771_s6, 4  ;;  %s3466_s9 = int_to_ptr.vmem [resolvable:$false] %s3465_s9 }
  0x30   : > { %p3463_p11 = pnand %p3461_p10, %p3449_p9  ;;  %s3467_s11 = scalar_lea.vmem %s3466_s9, 512 }
  0x31   : > { %p3468_p13 = scmp.lt.s32.totalorder %s469_s19, %s3466_s9  ;;  %p3469_p0 = scmp.lt.s32.totalorder %s3467_s11, %s3460_s12 }
  0x32   : > { %p3464_p12 = pneg %p3463_p11 }
  0x33   : > { %p3470_p4 = por %p3469_p0, %p3468_p13 }
  0x35   : > { %p3471_p3 = pnand %p3470_p4, %p3464_p12 }
  0x37   : > { %3474 = shalt.err (!%p3471_p3)
}
  0x38   : > { %s4623_s13 = smov 128   ;;  %s4624_s20 = smov 8  }
  0x39   : > { %3185 = dma.hbm_to_vmem [thread:$0]  (!%p3965_p8), %s467_s5, 256, %s469_s19, %s3969_s25, %s4623_s13, %s4623_s13, %s4624_s20  }
  0x3a   : > { %s3155_s24 = smul.u32 3072, %s3761_s21  ;;  %s97_s26 = sadd.s32 1, %s3737_s15 }
  0x3b   : > { %p104_p7 = scmp.ne.s32.totalorder %s3737_s15, %s3733_s30  ;;  %s3991_s28 = sand.u32 1, %s3737_s15  }
  0x3c   : > { %s3986_s27 = scalar_select %p3943_p5, %s3737_s15, %s97_s26  }
  0x3d   : > { %p106_p9 = por %p104_p7, %p58_p2  ;;  %s3154_s12 = smul.u32 192, %s3991_s28 }
  0x3e   : > { %4668 = sst [smem:[#allocation28_spill]] %s3986_s27  ;;  %s3156_s11 = smul.u32 3, %s3991_s28 }
  0x3f   : > { %s4669_s2 = sld [smem:[#allocation32_spill]]  ;;  %p3999_p10 = pnand %p3206_p6, %p106_p9 }
  0x40   : > { %s482_s14 = scalar_lea.vmem [#allocation7], %s3154_s12 }
  0x41   : > { %s4670_s5 = scalar_select %p3999_p10, 1, 0 }
  0x42   : > { %s489_s19 = sshll.u32 %s482_s14, 4  ;;  %p4006_p2 = pneg %p3999_p10  ;;  %s490_s19 = int_to_ptr.vmem [resolvable:$true] %s489_s19 }
  0x43   : > { %s3488_s13 = scalar_lea.vmem %s490_s19, 3072 }
  0x44   : > { %p3489_p5 = scmp.ne.s32.totalorder %s490_s19, %s3488_s13 }
  0x45   : > { %s488_s1 = scalar_lea.hbm %s4669_s2, %s3155_s24  ;;  %s3774_s24 = smov [#allocation7]  }
  0x46   : > { %p3491_p8 = pnand %p3489_p5, %p4006_p2  ;;  %s3493_s6 = sshll.u32 %s3774_s24, 4  ;;  %s3494_s6 = int_to_ptr.vmem [resolvable:$false] %s3493_s6 }
  0x47   : > { %s3495_s9 = scalar_lea.vmem %s3494_s6, 6144  ;;  %p3496_p6 = scmp.lt.s32.totalorder %s490_s19, %s3494_s6 }
  0x48   : > { %p3492_p11 = pneg %p3491_p8  ;;  %p3497_p12 = scmp.lt.s32.totalorder %s3495_s9, %s3488_s13 }
  0x4a   : > { %p3498_p13 = por %p3497_p12, %p3496_p6 }
  0x4c   : > { %p3499_p0 = pnand %p3498_p13, %p3492_p11 }
  0x4e   : > { %3502 = shalt.err (!%p3499_p0)
}
  0x4f   : > { %s3775_s12 = smov 192   ;;  %s3776_s14 = smov 12  }
  0x50   : > { %3188 = dma.hbm_to_vmem [thread:$0]  (!%p3999_p10), %s488_s1, 3072, %s490_s19, %s3969_s25, %s3775_s12, %s3775_s12, %s3776_s14  }
  0x51   : > { %s3157_s20 = smul.u32 48, %s3761_s21  ;;  %s503_s0 = scalar_lea.vmem [#allocation8], %s3156_s11 }
  0x52   : > { %s511_s2 = sshll.u32 %s503_s0, 4  ;;  %s2820_s24 = sshll.u32 %s3991_s28, 6  ;;  %s512_s2 = int_to_ptr.vmem [resolvable:$true] %s511_s2 }
  0x53   : > { %s4672_s3 = sld [smem:[#allocation33_spill]]  ;;  %s3516_s6 = scalar_lea.vmem %s512_s2, 48 }
  0x54   : > { %p3517_p4 = scmp.ne.s32.totalorder %s512_s2, %s3516_s6  ;;  %s3777_s9 = smov [#allocation8]  }
  0x55   : > { %s3521_s27 = sshll.u32 %s3777_s9, 4  ;;  %s3522_s27 = int_to_ptr.vmem [resolvable:$false] %s3521_s27 }
  0x56   : > { %p3519_p3 = pnand %p3517_p4, %p4006_p2  ;;  %s3523_s15 = scalar_lea.vmem %s3522_s27, 96 }
  0x57   : > { %p3524_p9 = scmp.lt.s32.totalorder %s512_s2, %s3522_s27  ;;  %p3525_p5 = scmp.lt.s32.totalorder %s3523_s15, %s3516_s6 }
  0x58   : > { %p3520_p7 = pneg %p3519_p3 }
  0x59   : > { %s509_s13 = scalar_lea.hbm %s4672_s3, %s3157_s20  ;;  %p3526_p8 = por %p3525_p5, %p3524_p9 }
  0x5b   : > { %p3527_p11 = pnand %p3526_p8, %p3520_p7 }
  0x5d   : > { %3530 = shalt.err (!%p3527_p11)
}
  0x5e   : > { %3191 = dma.hbm_to_vmem [thread:$0]  (!%p3999_p10), %s509_s13, 48, %s512_s2, %s3969_s25  }
  0x5f   : > { %s2936_s0 = sshll.u32 %s3761_s21, 10  ;;  %s4673_s4 = sld [smem:[#allocation34_spill]] }
  0x60   : > { %s522_s1 = scalar_lea.vmem [#allocation9], %s2820_s24  ;;  %s2823_s27 = sshll.u32 %s3991_s28, 7 }
  0x61   : > { %s529_s19 = sshll.u32 %s522_s1, 4  ;;  %s3778_s11 = smov [#allocation9]   ;;  %s530_s19 = int_to_ptr.vmem [resolvable:$true] %s529_s19 }
  0x62   : > { %s3544_s15 = scalar_lea.vmem %s530_s19, 1024  ;;  %s3549_s12 = sshll.u32 %s3778_s11, 4  ;;  %s3550_s12 = int_to_ptr.vmem [resolvable:$false] %s3549_s12 }
  0x63   : > { %p3545_p6 = scmp.ne.s32.totalorder %s530_s19, %s3544_s15  ;;  %s3551_s14 = scalar_lea.vmem %s3550_s12, 2048 }
  0x64   : > { %p3552_p0 = scmp.lt.s32.totalorder %s530_s19, %s3550_s12  ;;  %p3553_p4 = scmp.lt.s32.totalorder %s3551_s14, %s3544_s15 }
  0x65   : > { %s528_s20 = scalar_lea.hbm %s4673_s4, %s2936_s0  ;;  %p3547_p12 = pnand %p3545_p6, %p4006_p2 }
  0x66   : > { %p3554_p3 = por %p3553_p4, %p3552_p0 }
  0x67   : > { %p3548_p13 = pneg %p3547_p12 }
  0x69   : > { %p3555_p7 = pnand %p3554_p3, %p3548_p13 }
  0x6b   : > { %3558 = shalt.err (!%p3555_p7)
}
  0x6c   : > { %s4628_s2 = smov 64   ;;  %s4629_s24 = smov 4  }
  0x6d   : > { %3194 = dma.hbm_to_vmem [thread:$0]  (!%p3999_p10), %s528_s20, 1024, %s530_s19, %s3969_s25, %s4628_s2, %s4628_s2, %s4629_s24  }
  0x6e   : > { %s2937_s13 = sshll.u32 %s3761_s21, 11  ;;  %s4674_s8 = sld [smem:[#allocation38_spill]] }
  0x6f   : > { %s561_s7 = scalar_lea.vmem [#allocation10], %s2823_s27  ;;  %s3781_s15 = smov [#allocation10]  }
  0x70   : > { %s568_s22 = sshll.u32 %s561_s7, 4  ;;  %s3577_s11 = sshll.u32 %s3781_s15, 4  ;;  %s569_s22 = int_to_ptr.vmem [resolvable:$true] %s568_s22  ;;  %s3578_s11 = int_to_ptr.vmem [resolvable:$false] %s3577_s11 }
  0x71   : > { %s3572_s1 = scalar_lea.vmem %s569_s22, 2048  ;;  %s3579_s12 = scalar_lea.vmem %s3578_s11, 4096 }
  0x72   : > { %p3573_p9 = scmp.ne.s32.totalorder %s569_s22, %s3572_s1  ;;  %p3580_p11 = scmp.lt.s32.totalorder %s569_s22, %s3578_s11 }
  0x73   : > { %p3581_p6 = scmp.lt.s32.totalorder %s3579_s12, %s3572_s1 }
  0x74   : > { %s567_s0 = scalar_lea.hbm %s4674_s8, %s2937_s13  ;;  %p3575_p5 = pnand %p3573_p9, %p4006_p2 }
  0x75   : > { %p3582_p12 = por %p3581_p6, %p3580_p11 }
  0x76   : > { %p3576_p8 = pneg %p3575_p5 }
  0x78   : > { %p3583_p13 = pnand %p3582_p12, %p3576_p8 }
  0x7a   : > { %3586 = shalt.err (!%p3583_p13)
}
  0x7b   : > { %s4675_s20 = smov 8   ;;  %s4676_s19 = smov 128  }
  0x7c   : > { %3197 = dma.hbm_to_vmem [thread:$0]  (!%p3999_p10), %s567_s0, 2048, %s569_s22, %s3969_s25, %s4676_s19, %s4676_s19, %s4675_s20  }
  0x7d   : > { %s4055_s14 = sadd.s32 4294967295, %s3769_s23   ;;  %s2811_s6 = sadd.s32 4294967294, %s3769_s23  }
  0x7e   : > { %p63_p0 = scmp.ne.s32.totalorder %s3745_s17, %s3741_s16  ;;  %p4631_p4 = scmp.eq.s32.totalorder %s4055_s14, 0 }
  0x7f   : > { %p110_p3 = scmp.ne.s32.totalorder %s3733_s30, %s3729_s29  ;;  %p420_p7 = scmp.eq.s32.totalorder %s4055_s14, 3 }
  0x80   : > { %p426_p9 = scmp.eq.s32.totalorder %s2811_s6, 3  ;;  %p4066_p5 = por %p4631_p4, %p63_p0 }
  0x81   : > { %p4072_p8 = por %p110_p3, %p4631_p4  ;;  %p4079_p11 = por %p420_p7, %p57_p1 }
  0x82   : > { %p4083_p6 = por %p426_p9, %p63_p0  ;;  %p2812_p12 = scmp.ge.s32.totalorder %s3769_s23, 1 }
  0x83   : > { %s4679_s7 = scalar_select %p4079_p11, 1, 0 }
  0x84   : > { %s4680_s29 = scalar_select %p4083_p6, 1, 0 }
  0x85   : > { %p433_p13 = scmp.lt.s32.totalorder %s3769_s23, 5  ;;  %s3782_s1 = smov [#allocation5]  }
  0x86   : > { %4681 = sst [smem:[#allocation29_spill]] %s4680_s29  ;;  %s446_s15 = sshll.u32 %s3782_s1, 4  ;;  %s4100_s15 = int_to_ptr.vmem [resolvable:$true] %s446_s15 }
  0x87   : > { %p4089_p10 = pnand %p2812_p12, %p433_p13  ;;  %s4683_s10 = sld [smem:[#allocation40_spill]] }
  0x88   : > { %s589_s19 = scalar_lea.vmem [#allocation11], %s2823_s27  ;;  %s3783_s1 = smov [#allocation11]  }
  0x89   : > { %p3178_p3 = pneg %p4089_p10  ;;  %s596_s6 = sshll.u32 %s589_s19, 4  ;;  %s597_s6 = int_to_ptr.vmem [resolvable:$true] %s596_s6 }
  0x8a   : > { %s3600_s24 = scalar_lea.vmem %s597_s6, 2048  ;;  %s3605_s3 = sshll.u32 %s3783_s1, 4  ;;  %s3606_s3 = int_to_ptr.vmem [resolvable:$false] %s3605_s3 }
  0x8b   : > { %p4106_p1 = pnand %p3178_p3, %p4631_p4  ;;  %p3601_p0 = scmp.ne.s32.totalorder %s597_s6, %s3600_s24 }
  0x8c   : > { %p3608_p12 = scmp.lt.s32.totalorder %s597_s6, %s3606_s3 }
  0x8d   : > { %s595_s20 = scalar_lea.hbm %s4683_s10, %s2937_s13  ;;  %p3603_p7 = pnand %p3601_p0, %p4006_p2 }
  0x8e   : > { %s3607_s13 = scalar_lea.vmem %s3606_s3, 4096 }
  0x8f   : > { %p3604_p9 = pneg %p3603_p7  ;;  %p3609_p13 = scmp.lt.s32.totalorder %s3607_s13, %s3600_s24 }
  0x91   : > { %p3610_p6 = por %p3609_p13, %p3608_p12 }
  0x93   : > { %p3611_p11 = pnand %p3610_p6, %p3604_p9 }
  0x95   : > { %3614 = shalt.err (!%p3611_p11)
}
  0x96   : > { %p4685_p3 = scmp.ne.s32.totalorder %s4670_s5, 0  ;;  %s4686_s28 = smov 4  }
  0x97   : > { %s4687_s27 = smov 64   ;;  %p3617_p2 = pneg %p4106_p1 }
  0x98   : > { %3200 = dma.hbm_to_vmem [thread:$0]  (!%p4685_p3), %s595_s20, 2048, %s597_s6, %s3969_s25, %s4687_s27, %s4687_s27, %s4686_s28  }
  0x99   : > { %s3626_s26 = scalar_lea.vmem %s4100_s15, 128  ;;  %p3634_p6 = scmp.lt.s32.totalorder %s4100_s15, %s4100_s15 }
  0x9a   : > { %p3627_p0 = scmp.ne.s32.totalorder %s4100_s15, %s3626_s26  ;;  %p3635_p11 = scmp.lt.s32.totalorder %s3626_s26, %s3626_s26 }
  0x9c   : > { %p3629_p7 = pnand %p3627_p0, %p3617_p2  ;;  %p3636_p9 = por %p3635_p11, %p3634_p6 }
  0x9e   : > { %p3630_p4 = pneg %p3629_p7 }
  0xa0   : > { %p3637_p12 = pnand %p3636_p9, %p3630_p4 }
  0xa2   : > { %3640 = shalt.err (!%p3637_p12)
}
  0xa3   : > { %s4688_s24 = sld [smem:[#allocation31_spill]]  ;;  %s628_s25 = sand.u32 (!%p4089_p10), 1, %s4055_s14  }
  0xa4   : > { %s4632_s11 = sand.u32 (!%p4089_p10), 1, %s3745_s17   ;;  %s629_s20 = scalar_lea.sflag (!%p4089_p10), [#allocation3], %s628_s25 }
  0xa5   : > { %626 = sbr.rel (%p4089_p10) target bundleno = 2688 (0xa80), region = 76  ;;  %s4136_s12 = sshll.u32 (!%p4089_p10), %s4632_s11, 4 }
  0xa9   : > { %3181 = dma.hbm_to_vmem [thread:$0]  (!%p4106_p1), %s4688_s24, 128, %s4100_s15, [#allocation6]  }
  0xaa   : > { %3712 = dma.done.wait (%p4066_p5), %s629_s20, 256  }
  0xab   : > { %3714 = vsyncadd (%p4066_p5), %s629_s20, 4294967040  ;;  %p4689_p4 = scmp.eq.s32.totalorder %s4055_s14, 0 }
  0xad   : > { %3716 = dma.done.wait (%p4689_p4), [#allocation6], 128   ;;  %p4690_p10 = pmov %p4689_p4 }
  0xae   : > { %s643_s22 = sand.u32 1, %s3733_s30  }
  0xaf   : > { %3718 = vsyncadd (%p4690_p10), [#allocation6], 4294967168  ;;  %s3158_s15 = smul.u32 192, %s643_s22 }
  0xb1   : > { %s4148_s19 = scalar_lea.vmem [#allocation7], %s3158_s15 }
  0xb2   : > { %3720 = dma.done.wait (%p4072_p8), %s629_s20, 8240  }
  0xb3   : > { %3722 = vsyncadd (%p4072_p8), %s629_s20, 4294959056  ;;  %s4691_s6 = sld [smem:[#allocation21_spill]]  ;;  %s3159_s9 = smul.u32 3, %s643_s22 }
  0xb4   : > { %s2832_s1 = sshll.u32 %s643_s22, 6  ;;  %s2833_s13 = sshll.u32 %s643_s22, 7 }
  0xb5   : > { %s4694_s15 = sld [smem:[#allocation37_spill]]  ;;  %s4188_s20 = scalar_lea.vmem [#allocation8], %s3159_s9 }
  0xb6   : > { %s4695_s10 = sld [smem:[#allocation39_spill]]  ;;  %s4190_s22 = scalar_lea.vmem [#allocation9], %s2832_s1 }
  0xb7   : > { %s4696_s18 = sld [smem:[#allocation41_spill]]  ;;  %s4194_s4 = scalar_lea.vmem [#allocation11], %s2833_s13 }
  0xb8   : > { %s4697_s0 = sld [smem:[#allocation42_spill]]  ;;  %s4197_s8 = scalar_lea.vmem [#allocation12], %s4136_s12 }
  0xb9   : > { %p774_p5 = scmp.lt.s32.totalorder %s4691_s6, 1  ;;  %s4698_s24 = sld [smem:[#allocation43_spill]] }
  0xba   : > { %p2837_p8 = scmp.ne.s32.totalorder %s4691_s6, 0 }
  0xbb   : > { %s4156_s14 = scalar_select %p774_p5, %s4691_s6, 1 }
  0xbc   : > { %801 = sbr.rel (%p2837_p8) target bundleno = 198 (0xc6), region = 108 }
  0xbd   : > { %s782_s11 = scalar_lea.vmem %s4694_s15, %s4156_s14  ;;  %s2836_s2 = sshll.u32 %s4156_s14, 1 }
  0xbe   : > { %s4174_s28 = scalar_lea.vmem %s4695_s10, %s2836_s2  ;;  %s789_s30 = scalar_lea.vmem %s4696_s18, %s4156_s14 }
  0xbf   : > { %s792_s16 = scalar_lea.vmem %s4697_s0, %s4156_s14  ;;  %s795_s25 = scalar_lea.vmem %s4698_s24, %s4156_s14 }
  0xc0   : > { %s4192_s15 = scalar_lea.vmem [#allocation10], %s2833_s13  ;;  %s4699_s10 = scalar_lea.vmem (!%p2837_p8), [#allocation2], %s4136_s12 }
  0xc1   : > { %v802_v0 = vld [vmem:[%s4699_s10] sm:$0xff]  ;;  %s4700_s18 = smov %s4699_s10 }
  0xc2   : > { %v804_v1 = vld [vmem:[#allocation5] sm:$0xff]  ;;  %v803_v2 = vld [vmem:[%s4700_s18 + $0x8] sm:$0xff] }
  0xc3   : > { %v805_v3 = vadd.f32 %v804_v1, %v802_v0  ;;  %v806_v4 = vadd.f32 %v804_v1, %v803_v2 }
  0xc5   : > { %807 = vst [vmem:[%s4197_s8] sm:$0xff] %v805_v3  ;;  %808 = vst [vmem:[%s4197_s8 + $0x8] sm:$0xff] %v806_v4 }
  0xc6 PF: > { %v3327_v5 = vld [vmem:[%s4148_s19 + $0xac] ss:$12 sps:$4 sm:$0xff]   ;;  %v3329_v6 = vld [vmem:[%s4148_s19 + $0xa8] ss:$12 sps:$4 sm:$0xff]   ;;  %v3784_v7 = vmov 0   ;;  %v3785_v8 = vmov 0.0   ;;  %v846_v34 = vlaneseq }
  0xc7   : > { %1021 = vmatprep.mubr.bf16.mxu0 %v3784_v7  ;;  %3018 = vmatprep.subr.bf16.mxu1 %v3785_v8  ;;  %v3330_v9 = vld [vmem:[%s4148_s19 + $0x94] ss:$12 sps:$4 sm:$0xff]   ;;  %v3332_v10 = vld [vmem:[%s4148_s19 + $0x90] ss:$12 sps:$4 sm:$0xff]   ;;  %v3335_v12 = vld [vmem:[%s4148_s19 + $0x78] ss:$12 sps:$4 sm:$0xff]  }
  0xc8   : > { %989 = vmatprep.subr.bf16.mxu0 %v3327_v5  ;;  %v3333_v11 = vld [vmem:[%s4148_s19 + $0x7c] ss:$12 sps:$4 sm:$0xff]   ;;  %v3336_v13 = vld [vmem:[%s4148_s19 + $0x64] ss:$12 sps:$4 sm:$0xff]   ;;  %v3338_v14 = vld [vmem:[%s4148_s19 + $0x60] ss:$12 sps:$4 sm:$0xff]  }
  0xc9   : > { %990 = vmatpush1.bf16.msra.mxu0 %v3329_v6  ;;  %v3339_v15 = vld [vmem:[%s4148_s19 + $0x4c] ss:$12 sps:$4 sm:$0xff]   ;;  %v3351_v16 = vld [vmem:[%s4148_s19 + $0xb0] ss:$12 sps:$4 sm:$0xff]   ;;  %v3341_v18 = vld [vmem:[%s4148_s19 + $0x48] ss:$12 sps:$4 sm:$0xff]  }
  0xca   : > { %991 = vmatprep.subr.bf16.mxu0 %v3330_v9  ;;  %3019 = vmatpush3.bf16.msra.mxu1 %v3351_v16  ;;  %v3352_v17 = vld [vmem:[%s4148_s19 + $0x98] ss:$12 sps:$4 sm:$0xff]   ;;  %v3342_v19 = vld [vmem:[%s4148_s19 + $0x34] ss:$12 sps:$4 sm:$0xff]   ;;  %v3344_v20 = vld [vmem:[%s4148_s19 + $0x30] ss:$12 sps:$4 sm:$0xff]  }
  0xcb   : > { %3020 = vmatprep.subr.bf16.mxu1 %v3785_v8  ;;  %v3353_v21 = vld [vmem:[%s4148_s19 + $0x80] ss:$12 sps:$4 sm:$0xff]   ;;  %v3345_v22 = vld [vmem:[%s4148_s19 + $0x1c] ss:$12 sps:$4 sm:$0xff]   ;;  %v3347_v24 = vld [vmem:[%s4148_s19 + $0x18] ss:$12 sps:$4 sm:$0xff]  }
  0xcc   : > { %v3354_v23 = vld [vmem:[%s4148_s19 + $0x68] ss:$12 sps:$4 sm:$0xff]   ;;  %v3348_v25 = vld [vmem:[%s4148_s19 + $0x4] ss:$12 sps:$4 sm:$0xff]   ;;  %v3350_v27 = vld [vmem:[%s4148_s19] ss:$12 sps:$4 sm:$0xff]  }
  0xcd   : > { %992 = vmatpush1.bf16.msra.mxu0 %v3332_v10  ;;  %v3355_v26 = vld [vmem:[%s4148_s19 + $0x50] ss:$12 sps:$4 sm:$0xff]   ;;  %v3356_v30 = vld [vmem:[%s4148_s19 + $0x38] ss:$12 sps:$4 sm:$0xff]   ;;  %v3357_v32 = vld [vmem:[%s4148_s19 + $0x20] ss:$12 sps:$4 sm:$0xff]  }
  0xce   : > { %993 = vmatprep.subr.bf16.mxu0 %v3333_v11  ;;  %3021 = vmatpush3.bf16.msra.mxu1 %v3352_v17  ;;  %v4233_v28 = vld [vmem:[%s4197_s8] sm:$0xff]  ;;  %v4236_v29 = vld [vmem:[%s4197_s8 + $0x8] sm:$0xff]  ;;  %vm3786_vm0 = vmmov 0   ;;  %v4255_v35 = vshrl.u32 %v846_v34, 7  ;;  %vm1127_vm1 = vcmask 261120   ;;  %s3787_s21 = smov 96  }
  0xcf   : > { %3022 = vmatprep.subr.bf16.mxu1 %v3785_v8  ;;  %v811_v31 = vpack.c.bf16 %v4236_v29, %v4233_v28  ;;  %v3358_v33 = vld [vmem:[%s4148_s19 + $0x8] ss:$12 sps:$4 sm:$0xff]   ;;  %3034 = vmatprep.mubr.msk.bf16.mxu1 %vm3786_vm0, %v3785_v8  ;;  %v4260_v38 = vld [vmem:[%s4188_s20] sm:$0x7]  ;;  %s3788_s29 = smov 64   ;;  %s3789_s12 = smov 32  }
  0xd0   : > { %v852_v36 = vsub.s32 1, %v4255_v35  ;;  %v848_v37 = vsub.s32 0, %v4255_v35  ;;  %v856_v1 = vsub.s32 2, %v4255_v35  ;;  %vm1604_vm2 = vcmask 1043456   ;;  %s4701_s6 = sld [smem:[#allocation35_spill]]  ;;  %p4713_p13 = scmp.ne.s32.totalorder %s4679_s7, 0 }
  0xd1   : > { %994 = vmatpush1.bf16.msra.mxu0 %v3335_v12  ;;  %vm1504_vm3 = vcmask 64512   ;;  %vm1996_vm4 = vcmask 523264   ;;  %vm1999_vm5 = vcmask 785408   ;;  %s4703_s0 = sld [smem:[#allocation36_spill]]  ;;  %v2911_v35 = vld [vmem:[%s789_s30] ss:$0 sm:$0xff] }
  0xd2   : > { %995 = vmatprep.subr.bf16.mxu0 %v3336_v13  ;;  %3023 = vmatpush3.bf16.msra.mxu1 %v3353_v21  ;;  %v853_v39 = vrot.slane %v4260_v38, %v852_v36  ;;  %v849_v41 = vrot.slane %v4260_v38, %v848_v37  ;;  %v857_v6 = vrot.slane %v4260_v38, %v856_v1  ;;  %s4707_s30 = sld [smem:[#allocation22_spill]]  ;;  %s3790_s1 = smov [#allocation12]  }
  0xd3   : > { %3024 = vmatprep.subr.bf16.mxu1 %v3785_v8  ;;  %s4710_s19 = sld [smem:[#allocation44_spill]]  ;;  %s3645_s13 = sshll.u32 %s3790_s1, 4  ;;  %s3646_s13 = int_to_ptr.vmem [resolvable:$false] %s3645_s13 }
  0xd5   : > { %996 = vmatpush1.bf16.msra.mxu0 %v3338_v14 }
  0xd6   : > { %997 = vmatprep.subr.bf16.mxu0 %v3339_v15  ;;  %3025 = vmatpush3.bf16.msra.mxu1 %v3354_v23  ;;  %s4702_s9 = scalar_lea.vmem %s4701_s6, %s4156_s14 }
  0xd7   : > { %3026 = vmatprep.subr.bf16.mxu1 %v3785_v8  ;;  %s4704_s27 = scalar_lea.vmem %s4703_s0, %s4156_s14  ;;  %s3647_s0 = scalar_lea.vmem %s3646_s13, 512 }
  0xd9   : > { %998 = vmatpush1.bf16.msra.mxu0 %v3341_v18  ;;  %s4711_s6 = smov %s4710_s19 }
  0xda   : > { %999 = vmatprep.subr.bf16.mxu0 %v3342_v19  ;;  %3027 = vmatpush3.bf16.msra.mxu1 %v3355_v26 }
  0xdb   : > { %3028 = vmatprep.subr.bf16.mxu1 %v3785_v8 }
  0xdd   : > { %1000 = vmatpush1.bf16.msra.mxu0 %v3344_v20 }
  0xde   : > { %1001 = vmatprep.subr.bf16.mxu0 %v3345_v22  ;;  %3029 = vmatpush3.bf16.msra.mxu1 %v3356_v30 }
  0xdf   : > { %3030 = vmatprep.subr.bf16.mxu1 %v3785_v8 }
  0xe1   : > { %1002 = vmatpush1.bf16.msra.mxu0 %v3347_v24 }
  0xe2   : > { %1003 = vmatprep.subr.bf16.mxu0 %v3348_v25  ;;  %3031 = vmatpush3.bf16.msra.mxu1 %v3357_v32 }
  0xe3   : > { %3032 = vmatprep.subr.bf16.mxu1 %v3785_v8 }
  0xe5   : > { %1004 = vmatpush1.bf16.msra.mxu0 %v3350_v27 }
  0xe6   : > { %3062 = vmatprep.subr.bf16.mxu0 %v3785_v8  ;;  %3033 = vmatpush3.bf16.msra.mxu1 %v3358_v33 }
  0xe7   : > { %3038 = vmatprep.subr.bf16.mxu1 %v3785_v8 }
  0xe8   : > { %1022 = vmatmul.mubr.bf16.vlgmr.msra.gmra.mxu0 %v811_v31 }
  0xe9   : > { %3064 = vmatprep.mubr.msk.bf16.mxu0 %vm3786_vm0, %v3785_v8  ;;  %3035 = vmatmul.mubr.bf16.vlgmr.msra.gmra.mxu1 %v811_v31 }
  0xea   : > { %3040 = vmatprep.mubr.msk.bf16.mxu1 %vm3786_vm0, %v3785_v8 }
 0x1a8   : > { %v1023_v40 = vpop.f32.mrf.mxu0 }
 0x1a9   : > { %v1024_v45 = vadd.f32 %v1023_v40, %v849_v41  ;;  %v1066_v55 = vpop.f32.mrf.mxu1 }
 0x1aa   : > { %v1025_v42 = vpop.f32.mrf.mxu0  ;;  %v1067_v11 = vadd.f32 %v1066_v55, %v857_v6 }
 0x1ab   : > { %v1026_v43 = vadd.f32 %v1025_v42, %v853_v39  ;;  %v2939_v50 = vpack.c.bf16 %v1024_v45, %v1024_v45  ;;  %v3036_v56 = vpop.f32.mrf.mxu1 }
 0x1ac   : > { %v1027_v44 = vpop.f32.mrf.mxu0  ;;  %v4310_v14 = vpack.c.bf16 %v1067_v11, %v1067_v11 }
 0x1ad   : > { %v2941_v46 = vpack.c.bf16 %v1026_v43, %v1026_v43  ;;  %v1028_v51 = vadd.f32 %v1027_v44, %v849_v41  ;;  %v1069_v57 = vpop.f32.mrf.mxu1 }
 0x1ae   : > { %v1029_v47 = vpop.f32.mrf.mxu0  ;;  %v1070_v16 = vadd.f32 %v1069_v57, %v857_v6  ;;  %v1606_v18 = vsel %vm1604_vm2, %v4310_v14, 0 }
 0x1af   : > { %v1030_v48 = vadd.f32 %v1029_v47, %v853_v39  ;;  %1098 = vrot.lane.b32.xlu0 %v2941_v46, %s3787_s21  ;;  %v1132_v49 = vsel %vm1127_vm1, %v2941_v46, 0  ;;  %v2940_v53 = vpack.c.bf16 %v1028_v51, %v1028_v51  ;;  %v3037_v58 = vpop.f32.mrf.mxu1 }
 0x1b0   : > { %3039 = vmatpush3.bf16.xpose.msra.mxu1 %v1132_v49  ;;  %v4320_v20 = vpack.c.bf16 %v1070_v16, %v1070_v16 }
 0x1b1   : > { %v2942_v52 = vpack.c.bf16 %v1030_v48, %v1030_v48  ;;  %3044 = vmatprep.subr.bf16.mxu1 %v3785_v8 }
 0x1b2   : > { %v1652_v21 = vsel %vm1604_vm2, %v4320_v20, 0 }
 0x1b3   : > { %1100 = vrot.lane.b32.xlu1 %v2942_v52, %s3787_s21  ;;  %1081 = vrot.lane.b32.xlu0 %v2939_v50, %s3787_s21  ;;  %v1178_v54 = vsel %vm1127_vm1, %v2942_v52, 0 }
 0x1b7   : > { %1083 = vrot.lane.b32.xlu1 %v2940_v53, %s3787_s21  ;;  %1102 = vrot.lane.b32.xlu0 %v2941_v46, %s3788_s29 }
 0x1b8   : > { %3041 = vmatmul.mubr.msk.bf16.vlgmr.msra.gmra.mxu1 %vm1127_vm1, %v2939_v50 }
 0x1b9   : > { %3045 = vmatpush3.bf16.xpose.msra.mxu1 %v1178_v54  ;;  %3046 = vmatprep.mubr.msk.bf16.mxu1 %vm3786_vm0, %v3785_v8 }
 0x1ba   : > { %3050 = vmatprep.subr.bf16.mxu1 %v3785_v8 }
 0x1bb   : > { %1104 = vrot.lane.b32.xlu1 %v2942_v52, %s3788_s29  ;;  %1085 = vrot.lane.b32.xlu0 %v2939_v50, %s3788_s29 }
 0x1bf   : > { %1087 = vrot.lane.b32.xlu1 %v2940_v53, %s3788_s29  ;;  %1106 = vrot.lane.b32.xlu0 %v2941_v46, %s3789_s12 }
 0x1c0   : > { %3047 = vmatmul.mubr.msk.bf16.vlgmr.msra.gmra.mxu1 %vm1127_vm1, %v2940_v53 }
 0x1c1   : > { %3052 = vmatprep.mubr.msk.bf16.mxu1 %vm3786_vm0, %v3785_v8 }
 0x1c3   : > { %1108 = vrot.lane.b32.xlu1 %v2942_v52, %s3789_s12  ;;  %1089 = vrot.lane.b32.xlu0 %v2939_v50, %s3789_s12 }
 0x1c7   : > { %1091 = vrot.lane.b32.xlu1 %v2940_v53, %s3789_s12 }
 0x221   : > { %v1099_v59 = vpop.permute.xlu0 %1098 }
 0x222   : > { %v1224_v60 = vsel %vm1127_vm1, %v1099_v59, 0 }
 0x223   : > { %3051 = vmatpush3.bf16.xpose.msra.mxu1 %v1224_v60 }
 0x224   : > { %3056 = vmatprep.subr.bf16.mxu1 %v3785_v8 }
 0x225   : > { %v1101_v61 = vpop.permute.xlu1 %1100  ;;  %v1082_v62 = vpop.permute.xlu0 %1081 }
 0x226   : > { %v1270_v2 = vsel %vm1127_vm1, %v1101_v61, 0 }
 0x229   : > { %v1084_v63 = vpop.permute.xlu1 %1083  ;;  %v1103_v0 = vpop.permute.xlu0 %1102 }
 0x22a   : > { %v1316_v3 = vsel %vm1127_vm1, %v1103_v0, 0  ;;  %3053 = vmatmul.mubr.msk.bf16.vlgmr.msra.gmra.mxu1 %vm1127_vm1, %v1082_v62 }
 0x22b   : > { %3057 = vmatpush3.bf16.xpose.msra.mxu1 %v1270_v2  ;;  %3063 = vmatpush3.bf16.xpose.msra.mxu0 %v1316_v3 }
 0x22c   : > { %3058 = vmatprep.mubr.msk.bf16.mxu1 %vm3786_vm0, %v3785_v8  ;;  %3068 = vmatprep.subr.bf16.mxu1 %v3785_v8 }
 0x22d   : > { %v1105_v4 = vpop.permute.xlu1 %1104  ;;  %v1086_v5 = vpop.permute.xlu0 %1085  ;;  %3074 = vmatprep.subr.bf16.mxu0 %v3785_v8 }
 0x22e   : > { %v1362_v12 = vsel %vm1127_vm1, %v1105_v4, 0 }
 0x231   : > { %v1088_v9 = vpop.permute.xlu1 %1087  ;;  %v1107_v10 = vpop.permute.xlu0 %1106 }
 0x232   : > { %v1408_v13 = vsel %vm1127_vm1, %v1107_v10, 0  ;;  %3059 = vmatmul.mubr.msk.bf16.vlgmr.msra.gmra.mxu1 %vm1127_vm1, %v1084_v63  ;;  %3065 = vmatmul.mubr.msk.bf16.vlgmr.msra.gmra.mxu0 %vm1127_vm1, %v1086_v5 }
 0x233   : > { %3069 = vmatpush3.bf16.xpose.msra.mxu1 %v1362_v12  ;;  %3075 = vmatpush3.bf16.xpose.msra.mxu0 %v1408_v13 }
 0x234   : > { %3070 = vmatprep.mubr.msk.bf16.mxu1 %vm3786_vm0, %v3785_v8  ;;  %3076 = vmatprep.mubr.msk.bf16.mxu0 %vm3786_vm0, %v3785_v8 }
 0x235   : > { %3080 = vmatprep.subr.bf16.mxu1 %v3785_v8  ;;  %3086 = vmatprep.subr.bf16.mxu0 %v3785_v8  ;;  %v1109_v15 = vpop.permute.xlu1 %1108  ;;  %v1090_v17 = vpop.permute.xlu0 %1089 }
 0x236   : > { %v1454_v19 = vsel %vm1127_vm1, %v1109_v15, 0 }
 0x239   : > { %v1092_v22 = vpop.permute.xlu1 %1091 }
 0x23a   : > { %3071 = vmatmul.mubr.msk.bf16.vlgmr.msra.gmra.mxu1 %vm1127_vm1, %v1088_v9  ;;  %3077 = vmatmul.mubr.msk.bf16.vlgmr.msra.gmra.mxu0 %vm1127_vm1, %v1090_v17 }
 0x23b   : > { %3081 = vmatpush3.bf16.xpose.msra.mxu1 %v1454_v19  ;;  %3082 = vmatprep.mubr.msk.bf16.mxu1 %vm3786_vm0, %v3785_v8 }
 0x23c   : > { %3092 = vmatprep.subr.bf16.mxu1 %v3785_v8  ;;  %3087 = vmatpush3.bf16.msra.mxu0 %v1606_v18 }
 0x23d   : > { %3088 = vmatprep.mubr.msk.bf16.mxu0 %vm3786_vm0, %v3785_v8  ;;  %3098 = vmatprep.subr.bf16.mxu0 %v3785_v8 }
 0x242   : > { %3083 = vmatmul.mubr.msk.bf16.vlgmr.msra.gmra.mxu1 %vm1127_vm1, %v1092_v22 }
 0x243   : > { %3093 = vmatpush3.bf16.msra.mxu1 %v1652_v21  ;;  %3094 = vmatprep.mubr.msk.bf16.mxu1 %vm3786_vm0, %v3785_v8 }
 0x244   : > { %3104 = vmatprep.subr.bf16.mxu1 %v3785_v8 }
 0x278   : > { %v1168_v23 = vpop.f32.mrf.mxu1 }
 0x279   : > { %v1496_v24 = vmul.f32 0.17677669, %v1168_v23 }
 0x27a   : > { %v3042_v25 = vpop.f32.mrf.mxu1 }
 0x27b   : > { %v1505_v26 = vsel %vm1504_vm3, %v1496_v24, -inf }
 0x27c   : > { %1506 = vmax.xlane.f32.xlu0 %v1505_v26  ;;  %v1171_v27 = vpop.f32.mrf.mxu1 }
 0x27e   : > { %v3043_v30 = vpop.f32.mrf.mxu1 }
 0x280   : > { %v1214_v31 = vpop.f32.mrf.mxu1 }
 0x281   : > { %v1497_v32 = vmul.f32 0.17677669, %v1214_v31 }
 0x282   : > { %v3048_v33 = vpop.f32.mrf.mxu1 }
 0x283   : > { %v1508_v34 = vsel %vm1504_vm3, %v1497_v32, -inf }
 0x284   : > { %1509 = vmax.xlane.f32.xlu1 %v1508_v34  ;;  %v1217_v38 = vpop.f32.mrf.mxu1 }
 0x286   : > { %v3049_v39 = vpop.f32.mrf.mxu1 }
 0x2ea   : > { %v1260_v40 = vpop.f32.mrf.mxu1 }
 0x2eb   : > { %v1498_v41 = vmul.f32 0.17677669, %v1260_v40 }
 0x2ec   : > { %v3054_v42 = vpop.f32.mrf.mxu1 }
 0x2ed   : > { %v1511_v43 = vsel %vm1504_vm3, %v1498_v41, -inf }
 0x2ee   : > { %1512 = vmax.xlane.f32.xlu0 %v1511_v43  ;;  %v1263_v44 = vpop.f32.mrf.mxu1 }
 0x2f0   : > { %v3055_v45 = vpop.f32.mrf.mxu1 }
 0x2f2   : > { %v1306_v46 = vpop.f32.mrf.mxu1  ;;  %v1352_v47 = vpop.f32.mrf.mxu0 }
 0x2f3   : > { %v1499_v48 = vmul.f32 0.17677669, %v1306_v46  ;;  %v1500_v49 = vmul.f32 0.17677669, %v1352_v47 }
 0x2f4   : > { %v3060_v50 = vpop.f32.mrf.mxu1  ;;  %v3066_v51 = vpop.f32.mrf.mxu0 }
 0x2f5   : > { %v1517_v52 = vsel %vm1504_vm3, %v1500_v49, -inf  ;;  %v1514_v53 = vsel %vm1504_vm3, %v1499_v48, -inf }
 0x2f6   : > { %v1355_v54 = vpop.f32.mrf.mxu0  ;;  %1518 = vmax.xlane.f32.xlu1 %v1517_v52  ;;  %1515 = vmax.xlane.f32.xlu0 %v1514_v53  ;;  %v1309_v55 = vpop.f32.mrf.mxu1 }
 0x2f8   : > { %v3061_v56 = vpop.f32.mrf.mxu1  ;;  %v3067_v57 = vpop.f32.mrf.mxu0 }
 0x2fa   : > { %v1398_v58 = vpop.f32.mrf.mxu1  ;;  %v1444_v59 = vpop.f32.mrf.mxu0 }
 0x2fb   : > { %v4337_v60 = vmul.f32 0.17677669, %v1398_v58  ;;  %v4339_v61 = vmul.f32 0.17677669, %v1444_v59 }
 0x2fc   : > { %v3072_v62 = vpop.f32.mrf.mxu1  ;;  %v3078_v63 = vpop.f32.mrf.mxu0 }
 0x2fd   : > { %v1523_v0 = vsel %vm1504_vm3, %v4339_v61, -inf  ;;  %v1520_v1 = vsel %vm1504_vm3, %v4337_v60, -inf }
 0x2fe   : > { %v1447_v2 = vpop.f32.mrf.mxu0  ;;  %1524 = vmax.xlane.f32.xlu1 %v1523_v0  ;;  %1521 = vmax.xlane.f32.xlu0 %v1520_v1  ;;  %v1401_v3 = vpop.f32.mrf.mxu1 }
 0x300   : > { %v3073_v4 = vpop.f32.mrf.mxu1  ;;  %v3079_v5 = vpop.f32.mrf.mxu0 }
 0x302   : > { %v1490_v6 = vpop.f32.mrf.mxu1 }
 0x303   : > { %v1503_v9 = vmul.f32 0.17677669, %v1490_v6 }
 0x304   : > { %v3084_v10 = vpop.f32.mrf.mxu1 }
 0x305   : > { %v1526_v11 = vsel %vm1504_vm3, %v1503_v9, -inf  ;;  %v1507_v18 = vpop.xlane.xlu0 %1506 }
 0x306   : > { %1527 = vmax.xlane.f32.xlu0 %v1526_v11  ;;  %v1493_v12 = vpop.f32.mrf.mxu1  ;;  %v1529_v19 = vsub.f32 %v1496_v24, %v1507_v18 }
 0x308   : > { %v3085_v13 = vpop.f32.mrf.mxu1  ;;  %v1537_v21 = vmul.f32 1.442695, %v1529_v19 }
 0x30d   : > { %v1510_v15 = vpop.xlane.xlu1 %1509 }
 0x30e   : > { %v1530_v16 = vsub.f32 %v1497_v32, %v1510_v15 }
 0x30f   : > { %1115 = vrot.lane.b32.xlu1 %v4310_v14, %s3787_s21 }
 0x310   : > { %v1539_v17 = vmul.f32 1.442695, %v1530_v16 }
 0x312   : > { %3407 = vpow2.f32 %v1539_v17 }
 0x313   : > { %3409 = vpow2.f32 %v1537_v21 }
 0x31f   : > { %v3408_v22 = vpop.eup %3407 }
 0x320   : > { %v1556_v23 = vsel %vm1504_vm3, %v3408_v22, 0.0  ;;  %v3410_v25 = vpop.eup %3409 }
 0x321   : > { %1557 = vadd.xlane.f32.xlu0 %v1556_v23  ;;  %v1553_v26 = vsel %vm1504_vm3, %v3410_v25, 0.0 }
 0x333   : > { %1554 = vadd.xlane.f32.xlu1 %v1553_v26 }
 0x377   : > { %v1513_v27 = vpop.xlane.xlu0 %1512 }
 0x378   : > { %v1531_v30 = vsub.f32 %v1498_v41, %v1513_v27 }
 0x37a   : > { %v1541_v31 = vmul.f32 1.442695, %v1531_v30 }
 0x37c   : > { %3411 = vpow2.f32 %v1541_v31 }
 0x37f   : > { %v1519_v32 = vpop.xlane.xlu1 %1518  ;;  %v1516_v33 = vpop.xlane.xlu0 %1515 }
 0x380   : > { %v1533_v34 = vsub.f32 %v1500_v49, %v1519_v32  ;;  %v1532_v38 = vsub.f32 %v1499_v48, %v1516_v33 }
 0x382   : > { %v1545_v39 = vmul.f32 1.442695, %v1533_v34  ;;  %v1543_v24 = vmul.f32 1.442695, %v1532_v38 }
 0x384   : > { %3413 = vpow2.f32 %v1545_v39 }
 0x385   : > { %3415 = vpow2.f32 %v1543_v24 }
 0x387   : > { %v1522_v46 = vpop.xlane.xlu0 %1521  ;;  %v1525_v49 = vpop.xlane.xlu1 %1524 }
 0x388   : > { %v1534_v50 = vsub.f32 %v4337_v60, %v1522_v46  ;;  %v1535_v51 = vsub.f32 %v4339_v61, %v1525_v49 }
 0x389   : > { %v4350_v40 = vpop.eup %3411 }
 0x38a   : > { %v1559_v42 = vsel %vm1504_vm3, %v4350_v40, 0.0  ;;  %v1547_v52 = vmul.f32 1.442695, %v1534_v50  ;;  %v1549_v54 = vmul.f32 1.442695, %v1535_v51 }
 0x38b   : > { %1560 = vadd.xlane.f32.xlu1 %v1559_v42  ;;  %v1116_v56 = vpop.permute.xlu1 %1115 }
 0x38c   : > { %v1698_v6 = vsel %vm1604_vm2, %v1116_v56, 0 }
 0x38f   : > { %v1528_v47 = vpop.xlane.xlu0 %1527 }
 0x390   : > { %v1536_v53 = vsub.f32 %v1503_v9, %v1528_v47 }
 0x391   : > { %v4354_v43 = vpop.eup %3413 }
 0x392   : > { %v4356_v44 = vpop.eup %3415  ;;  %v1565_v41 = vsel %vm1504_vm3, %v4354_v43, 0.0  ;;  %v1551_v57 = vmul.f32 1.442695, %v1536_v53 }
 0x393   : > { %1566 = vadd.xlane.f32.xlu1 %v1565_v41  ;;  %v1562_v45 = vsel %vm1504_vm3, %v4356_v44, 0.0 }
 0x394   : > { %1563 = vadd.xlane.f32.xlu0 %v1562_v45 }
 0x3a4   : > { %1119 = vrot.lane.b32.xlu1 %v4310_v14, %s3788_s29 }
 0x3a8   : > { %1121 = vrot.lane.b32.xlu1 %v4320_v20, %s3788_s29 }
 0x3aa   : > { %1117 = vrot.lane.b32.xlu0 %v4320_v20, %s3787_s21  ;;  %v1558_v48 = vpop.xlane.xlu0 %1557 }
 0x3ab   : > { %3417 = vrcp.f32 %v1558_v48 }
 0x3ac   : > { %3419 = vpow2.f32 %v1547_v52 }
 0x3ad   : > { %3421 = vpow2.f32 %v1549_v54 }
 0x3ae   : > { %3423 = vpow2.f32 %v1551_v57  ;;  %v3359_v57 = vld [vmem:[%s4190_s22 + $0x38] sm:$0xff]  }
 0x3b8   : > { %v3418_v55 = vpop.eup %3417 }
 0x3b9   : > { %v1586_v58 = vmul.f32 %v3418_v55, %v3408_v22  ;;  %v4373_v60 = vpop.eup %3419 }
 0x3ba   : > { %v4375_v61 = vpop.eup %3421  ;;  %v1568_v63 = vsel %vm1504_vm3, %v4373_v60, 0.0 }
 0x3bb   : > { %v1594_v59 = vpack.c.bf16 %v1586_v58, %v1586_v58  ;;  %v4379_v0 = vpop.eup %3423  ;;  %v1571_v2 = vsel %vm1504_vm3, %v4375_v61, 0.0 }
 0x3bc   : > { %v1555_v62 = vpop.xlane.xlu1 %1554  ;;  %v1574_v4 = vsel %vm1504_vm3, %v4379_v0, 0.0 }
 0x3bd   : > { %3425 = vrcp.f32 %v1555_v62  ;;  %3095 = vmatmul.mubr.msk.bf16.vlgmr.msra.gmra.mxu1 %vm1504_vm3, %v1594_v59  ;;  %v3360_v59 = vld [vmem:[%s4190_s22 + $0x30] sm:$0xff]  }
 0x3be   : > { %3106 = vmatprep.mubr.msk.bf16.mxu1 %vm3786_vm0, %v3785_v8 }
 0x3c9   : > { %1569 = vadd.xlane.f32.xlu0 %v1568_v63 }
 0x3ca   : > { %v3426_v1 = vpop.eup %3425 }
 0x3cb   : > { %v1585_v3 = vmul.f32 %v3426_v1, %v3410_v25 }
 0x3cc   : > { %1572 = vadd.xlane.f32.xlu1 %v1571_v2 }
 0x3cd   : > { %1575 = vadd.xlane.f32.xlu0 %v1574_v4  ;;  %v1593_v5 = vpack.c.bf16 %v1585_v3, %v1585_v3  ;;  %v3362_v3 = vld [vmem:[%s4190_s22 + $0x20] sm:$0xff]  }
 0x3cf   : > { %3089 = vmatmul.mubr.msk.bf16.vlgmr.msra.gmra.mxu0 %vm1504_vm3, %v1593_v5 }
 0x3d0   : > { %3099 = vmatpush3.bf16.msra.mxu0 %v1698_v6  ;;  %3100 = vmatprep.mubr.msk.bf16.mxu0 %vm3786_vm0, %v3785_v8 }
 0x3d1   : > { %3110 = vmatprep.subr.bf16.mxu0 %v3785_v8 }
 0x3dd   : > { %1125 = vrot.lane.b32.xlu1 %v4320_v20, %s3789_s12 }
 0x3e3   : > { %1123 = vrot.lane.b32.xlu0 %v4310_v14, %s3789_s12 }
 0x414   : > { %v1561_v9 = vpop.xlane.xlu1 %1560 }
 0x415   : > { %3427 = vrcp.f32 %v1561_v9 }
 0x41c   : > { %v1567_v10 = vpop.xlane.xlu1 %1566 }
 0x41d   : > { %3429 = vrcp.f32 %v1567_v10  ;;  %v1564_v11 = vpop.xlane.xlu0 %1563  ;;  %v3363_v10 = vld [vmem:[%s4190_s22 + $0x18] sm:$0xff]  }
 0x41e   : > { %3431 = vrcp.f32 %v1564_v11  ;;  %v3364_v11 = vld [vmem:[%s4190_s22 + $0x10] sm:$0xff]  }
 0x420   : > { %v1120_v17 = vpop.permute.xlu1 %1119 }
 0x421   : > { %v1118_v12 = vpop.permute.xlu0 %1117  ;;  %v1790_v18 = vsel %vm1604_vm2, %v1120_v17, 0 }
 0x422   : > { %v3428_v13 = vpop.eup %3427  ;;  %v1744_v15 = vsel %vm1604_vm2, %v1118_v12, 0  ;;  %v3365_v12 = vld [vmem:[%s4190_s22 + $0x8] sm:$0xff]  }
 0x423   : > { %3105 = vmatpush3.bf16.msra.mxu1 %v1744_v15  ;;  %v1587_v16 = vmul.f32 %v3428_v13, %v4350_v40  ;;  %v3366_v13 = vld [vmem:[%s4190_s22] sm:$0xff]  }
 0x424   : > { %3116 = vmatprep.subr.bf16.mxu1 %v3785_v8  ;;  %v1122_v23 = vpop.permute.xlu1 %1121 }
 0x425   : > { %v1595_v20 = vpack.c.bf16 %v1587_v16, %v1587_v16  ;;  %v1836_v27 = vsel %vm1604_vm2, %v1122_v23, 0 }
 0x427   : > { %3101 = vmatmul.mubr.msk.bf16.vlgmr.msra.gmra.mxu0 %vm1504_vm3, %v1595_v20 }
 0x428   : > { %3111 = vmatpush3.bf16.msra.mxu0 %v1790_v18  ;;  %3112 = vmatprep.mubr.msk.bf16.mxu0 %vm3786_vm0, %v3785_v8 }
 0x429   : > { %3122 = vmatprep.subr.bf16.mxu0 %v3785_v8 }
 0x42a   : > { %v3430_v14 = vpop.eup %3429 }
 0x42b   : > { %v3432_v19 = vpop.eup %3431  ;;  %v1589_v21 = vmul.f32 %v3430_v14, %v4354_v43 }
 0x42c   : > { %v1588_v22 = vmul.f32 %v3432_v19, %v4356_v44 }
 0x42d   : > { %v1597_v25 = vpack.c.bf16 %v1589_v21, %v1589_v21 }
 0x42e   : > { %v1596_v26 = vpack.c.bf16 %v1588_v22, %v1588_v22 }
 0x42f   : > { %3113 = vmatmul.mubr.msk.bf16.vlgmr.msra.gmra.mxu0 %vm1504_vm3, %v1597_v25 }
 0x430   : > { %3107 = vmatmul.mubr.msk.bf16.vlgmr.msra.gmra.mxu1 %vm1504_vm3, %v1596_v26  ;;  %3124 = vmatprep.mubr.msk.bf16.mxu0 %vm3786_vm0, %v3785_v8 }
 0x431   : > { %3117 = vmatpush3.bf16.msra.mxu1 %v1836_v27  ;;  %3118 = vmatprep.mubr.msk.bf16.mxu1 %vm3786_vm0, %v3785_v8 }
 0x432   : > { %3128 = vmatprep.subr.bf16.mxu1 %v3785_v8 }
 0x452   : > { %v1570_v30 = vpop.xlane.xlu0 %1569 }
 0x453   : > { %3433 = vrcp.f32 %v1570_v30 }
 0x455   : > { %v1573_v31 = vpop.xlane.xlu1 %1572 }
 0x456   : > { %3435 = vrcp.f32 %v1573_v31  ;;  %v1576_v32 = vpop.xlane.xlu0 %1575 }
 0x457   : > { %3437 = vrcp.f32 %v1576_v32 }
 0x459   : > { %v1126_v24 = vpop.permute.xlu1 %1125 }
 0x45a   : > { %v1124_v33 = vpop.permute.xlu0 %1123  ;;  %v1928_v41 = vsel %vm1604_vm2, %v1126_v24, 0 }
 0x45b   : > { %v1882_v34 = vsel %vm1604_vm2, %v1124_v33, 0 }
 0x45c   : > { %3123 = vmatpush3.bf16.msra.mxu0 %v1882_v34 }
 0x45d   : > { %3134 = vmatprep.subr.bf16.mxu0 %v3785_v8 }
 0x460   : > { %v3434_v38 = vpop.eup %3433 }
 0x461   : > { %v1590_v39 = vmul.f32 %v3434_v38, %v4373_v60  ;;  %v3361_v60 = vld [vmem:[%s4190_s22 + $0x28] sm:$0xff]  }
 0x463   : > { %v3436_v40 = vpop.eup %3435  ;;  %v1598_v42 = vpack.c.bf16 %v1590_v39, %v1590_v39 }
 0x464   : > { %v3438_v43 = vpop.eup %3437  ;;  %v1591_v44 = vmul.f32 %v3436_v40, %v4375_v61 }
 0x465   : > { %3119 = vmatmul.mubr.msk.bf16.vlgmr.msra.gmra.mxu1 %vm1504_vm3, %v1598_v42  ;;  %v1592_v46 = vmul.f32 %v3438_v43, %v4379_v0 }
 0x466   : > { %3129 = vmatpush3.bf16.msra.mxu1 %v1928_v41  ;;  %v1599_v45 = vpack.c.bf16 %v1591_v44, %v1591_v44  ;;  %3130 = vmatprep.mubr.msk.bf16.mxu1 %vm3786_vm0, %v3785_v8 }
 0x467   : > { %v1600_v47 = vpack.c.bf16 %v1592_v46, %v1592_v46 }
 0x468   : > { %3125 = vmatmul.mubr.msk.bf16.vlgmr.msra.gmra.mxu0 %vm1504_vm3, %v1599_v45 }
 0x469   : > { %3150 = vmatprep.mubr.msk.bf16.mxu0 %vm3786_vm0, %v3785_v8  ;;  %3135 = vmatpush3.bf16.msra.mxu0 %v3359_v57  ;;  %v3367_v57 = vld [vmem:[%s4192_s15 + $0x70] ss:$8 sps:$4 sm:$0xff]  }
 0x46a   : > { %3136 = vmatprep.subr.bf16.mxu0 %v3785_v8 }
 0x46d   : > { %3131 = vmatmul.mubr.msk.bf16.vlgmr.msra.gmra.mxu1 %vm1504_vm3, %v1600_v47  ;;  %3137 = vmatpush3.bf16.msra.mxu0 %v3360_v59 }
 0x46e   : > { %2299 = vmatprep.mubr.bf16.mxu1 %v3784_v7  ;;  %3138 = vmatprep.subr.bf16.mxu0 %v3785_v8 }
 0x471   : > { %3139 = vmatpush3.bf16.msra.mxu0 %v3361_v60 }
 0x472   : > { %3140 = vmatprep.subr.bf16.mxu0 %v3785_v8 }
 0x475   : > { %3141 = vmatpush3.bf16.msra.mxu0 %v3362_v3  ;;  %v3373_v3 = vld [vmem:[%s4192_s15 + $0x50] ss:$8 sps:$4 sm:$0xff]  }
 0x476   : > { %3142 = vmatprep.subr.bf16.mxu0 %v3785_v8 }
 0x479   : > { %3143 = vmatpush3.bf16.msra.mxu0 %v3363_v10  ;;  %v3384_v10 = vld [vmem:[%s4192_s15 + $0x24] ss:$8 sps:$4 sm:$0xff]  }
 0x47a   : > { %3144 = vmatprep.subr.bf16.mxu0 %v3785_v8 }
 0x47d   : > { %v4426_v48 = vpop.f32.mrf.mxu1  ;;  %3145 = vmatpush3.bf16.msra.mxu0 %v3364_v11  ;;  %v3382_v11 = vld [vmem:[%s4192_s15 + $0x20] ss:$8 sps:$4 sm:$0xff]  }
 0x47e   : > { %3146 = vmatprep.subr.bf16.mxu0 %v3785_v8 }
 0x47f   : > { %v3096_v49 = vpop.f32.mrf.mxu1 }
 0x480   : > { %v2884_v49 = vld [vmem:[%s4702_s9] ss:$0 sm:$0xff] }
 0x481   : > { %v1691_v50 = vpop.f32.mrf.mxu1  ;;  %3147 = vmatpush3.bf16.msra.mxu0 %v3365_v12  ;;  %v3387_v12 = vld [vmem:[%s4192_s15 + $0x14] ss:$8 sps:$4 sm:$0xff]  }
 0x482   : > { %3148 = vmatprep.subr.bf16.mxu0 %v3785_v8 }
 0x483   : > { %v3097_v51 = vpop.f32.mrf.mxu1 }
 0x485   : > { %3149 = vmatpush3.bf16.msra.mxu0 %v3366_v13  ;;  %v3385_v13 = vld [vmem:[%s4192_s15 + $0x10] ss:$8 sps:$4 sm:$0xff]  }
 0x48f   : > { %v4428_v52 = vpop.f32.mrf.mxu0 }
 0x491   : > { %v3090_v53 = vpop.f32.mrf.mxu0 }
 0x493   : > { %v1645_v54 = vpop.f32.mrf.mxu0 }
 0x495   : > { %v3091_v55 = vpop.f32.mrf.mxu0 }
 0x4e7   : > { %v1734_v56 = vpop.f32.mrf.mxu0 }
 0x4e9   : > { %v3102_v58 = vpop.f32.mrf.mxu0 }
 0x4ea   : > { %v3369_v58 = vld [vmem:[%s4192_s15 + $0x74] ss:$8 sps:$4 sm:$0xff]  }
 0x4eb   : > { %v1737_v62 = vpop.f32.mrf.mxu0  ;;  %2267 = vmatprep.subr.bf16.mxu1 %v3369_v58 }
 0x4ec   : > { %2268 = vmatpush1.bf16.msra.mxu1 %v3367_v57 }
 0x4ed   : > { %v3103_v7 = vpop.f32.mrf.mxu0 }
 0x4ef   : > { %v1826_v61 = vpop.f32.mrf.mxu0 }
 0x4f0   : > { %v1780_v63 = vpop.f32.mrf.mxu1 }
 0x4f1   : > { %v3312_v0 = vpack.i.bf16 %v1780_v63, %v1734_v56  ;;  %v3114_v1 = vpop.f32.mrf.mxu0 }
 0x4f2   : > { %v3108_v2 = vpop.f32.mrf.mxu1  ;;  %v3370_v1 = vld [vmem:[%s4192_s15 + $0x60] ss:$8 sps:$4 sm:$0xff]  }
 0x4f3   : > { %3313 = vrot.lane.b32.xlu0 %v3312_v0, %s3789_s12  ;;  %v1829_v4 = vpop.f32.mrf.mxu0  ;;  %v3372_v0 = vld [vmem:[%s4192_s15 + $0x64] ss:$8 sps:$4 sm:$0xff]   ;;  %v3375_v2 = vld [vmem:[%s4192_s15 + $0x54] ss:$8 sps:$4 sm:$0xff]  }
 0x4f4   : > { %v1783_v5 = vpop.f32.mrf.mxu1  ;;  %2269 = vmatprep.subr.bf16.mxu1 %v3372_v0  ;;  %v3376_v4 = vld [vmem:[%s4192_s15 + $0x40] ss:$8 sps:$4 sm:$0xff]  }
 0x4f5   : > { %v3115_v6 = vpop.f32.mrf.mxu0  ;;  %2270 = vmatpush1.bf16.msra.mxu1 %v3370_v1  ;;  %v3378_v5 = vld [vmem:[%s4192_s15 + $0x44] ss:$8 sps:$4 sm:$0xff]  }
 0x4f6   : > { %v3109_v9 = vpop.f32.mrf.mxu1  ;;  %2271 = vmatprep.subr.bf16.mxu1 %v3375_v2  ;;  %v3381_v6 = vld [vmem:[%s4192_s15 + $0x34] ss:$8 sps:$4 sm:$0xff]  }
 0x4f7   : > { %v3379_v9 = vld [vmem:[%s4192_s15 + $0x30] ss:$8 sps:$4 sm:$0xff]  }
 0x4f9   : > { %2272 = vmatpush1.bf16.msra.mxu1 %v3373_v3 }
 0x4fa   : > { %2273 = vmatprep.subr.bf16.mxu1 %v3378_v5 }
 0x4fd   : > { %2274 = vmatpush1.bf16.msra.mxu1 %v3376_v4 }
 0x4fe   : > { %2275 = vmatprep.subr.bf16.mxu1 %v3381_v6 }
 0x501   : > { %2276 = vmatpush1.bf16.msra.mxu1 %v3379_v9 }
 0x502   : > { %2277 = vmatprep.subr.bf16.mxu1 %v3384_v10 }
 0x505   : > { %2278 = vmatpush1.bf16.msra.mxu1 %v3382_v11 }
 0x506   : > { %2279 = vmatprep.subr.bf16.mxu1 %v3387_v12 }
 0x509   : > { %2280 = vmatpush1.bf16.msra.mxu1 %v3385_v13 }
 0x525   : > { %v1872_v15 = vpop.f32.mrf.mxu1 }
 0x526   : > { %v3317_v16 = vpack.i.bf16 %v1872_v15, %v1826_v61  ;;  %v3390_v15 = vld [vmem:[%s4192_s15 + $0x4] ss:$8 sps:$4 sm:$0xff]  }
 0x527   : > { %v3120_v17 = vpop.f32.mrf.mxu1  ;;  %2281 = vmatprep.subr.bf16.mxu1 %v3390_v15 }
 0x528   : > { %3318 = vrot.lane.b32.xlu1 %v3317_v16, %s3788_s29  ;;  %v1918_v20 = vpop.f32.mrf.mxu0  ;;  %v3388_v16 = vld [vmem:[%s4192_s15] ss:$8 sps:$4 sm:$0xff]   ;;  %v3391_v17 = vld [vmem:[%s4194_s4 + $0x78] sm:$0xff]   ;;  %s2550_s29 = sshll.u32 %s4197_s8, 4  ;;  %s4539_s29 = int_to_ptr.vmem [resolvable:$true] %s2550_s29 }
 0x529   : > { %v1875_v18 = vpop.f32.mrf.mxu1  ;;  %2282 = vmatpush1.bf16.msra.mxu1 %v3388_v16  ;;  %2996 = vmatprep.subr.bf16.mxu0 %v3391_v17  ;;  %p3648_p0 = scmp.lt.s32.totalorder %s4539_s29, %s3646_s13 }
 0x52a   : > { %v3126_v14 = vpop.f32.mrf.mxu0  ;;  %v3393_v18 = vld [vmem:[%s4194_s4 + $0x70] sm:$0xff]  }
 0x52b   : > { %v3121_v19 = vpop.f32.mrf.mxu1  ;;  %v3394_v14 = vld [vmem:[%s4194_s4 + $0x30] sm:$0xff]  }
 0x52c   : > { %v1921_v21 = vpop.f32.mrf.mxu0  ;;  %v3395_v19 = vld [vmem:[%s4194_s4 + $0x68] sm:$0xff]  }
 0x52d   : > { %v1964_v22 = vpop.f32.mrf.mxu1  ;;  %v3396_v21 = vld [vmem:[%s4194_s4 + $0x28] sm:$0xff]  }
 0x52e   : > { %v3322_v23 = vpack.i.bf16 %v1964_v22, %v1918_v20  ;;  %v3127_v25 = vpop.f32.mrf.mxu0  ;;  %v3392_v20 = vld [vmem:[%s4194_s4 + $0x38] sm:$0xff]   ;;  %v3397_v22 = vld [vmem:[%s4194_s4 + $0x60] sm:$0xff]  }
 0x52f   : > { %v3132_v26 = vpop.f32.mrf.mxu1  ;;  %v3399_v25 = vld [vmem:[%s4194_s4 + $0x58] sm:$0xff]  }
 0x530   : > { %3323 = vrot.lane.b32.xlu0 %v3322_v23, %s3787_s21  ;;  %v3398_v23 = vld [vmem:[%s4194_s4 + $0x20] sm:$0xff]   ;;  %v3400_v26 = vld [vmem:[%s4194_s4 + $0x18] sm:$0xff]   ;;  %s2945_s21 = sshll.u32 %s4707_s30, 8 }
 0x531   : > { %v1967_v27 = vpop.f32.mrf.mxu1  ;;  %s4537_s9 = scalar_lea.hbm %s4710_s19, %s2945_s21 }
 0x533   : > { %v3133_v8 = vpop.f32.mrf.mxu1 }
 0x565   : > { %v3314_v30 = vpop.permute.xlu0 %3313 }
 0x566   : > { %v3316_v32 = vunpack.i.h.bf16 %v3314_v30  ;;  %v3315_v33 = vunpack.i.l.bf16 %v3314_v30 }
 0x568   : > { %v1995_v24 = vsel %vm1127_vm1, %v4426_v48, %v3316_v32  ;;  %v1994_v40 = vsel %vm1127_vm1, %v4428_v52, %v3315_v33 }
 0x59a   : > { %v3319_v31 = vpop.permute.xlu1 %3318 }
 0x59b   : > { %v3321_v34 = vunpack.i.h.bf16 %v3319_v31  ;;  %v3320_v38 = vunpack.i.l.bf16 %v3319_v31 }
 0x59d   : > { %v1998_v44 = vsel %vm1996_vm4, %v1995_v24, %v3321_v34  ;;  %v1997_v41 = vsel %vm1996_vm4, %v1994_v40, %v3320_v38 }
 0x5a2   : > { %v3324_v39 = vpop.permute.xlu0 %3323 }
 0x5a3   : > { %v3326_v42 = vunpack.i.h.bf16 %v3324_v39  ;;  %v3325_v43 = vunpack.i.l.bf16 %v3324_v39  ;;  %v2893_v39 = vld [vmem:[%s4704_s27] ss:$0 sm:$0xff] }
 0x5a5   : > { %v2001_v45 = vsel %vm1999_vm5, %v1998_v44, %v3326_v42  ;;  %v2000_v46 = vsel %vm1999_vm5, %v1997_v41, %v3325_v43  ;;  %v2894_v43 = vld [vmem:[%s782_s11] ss:$0 sm:$0xff] }
 0x5a6   : > { %v2002_v47 = vpack.c.bf16 %v2001_v45, %v2000_v46 }
 0x5a8   : > { %3151 = vmatmul.mubr.bf16.vlgmr.msra.gmra.mxu0 %v2002_v47  ;;  %v3401_v47 = vld [vmem:[%s4194_s4 + $0x50] sm:$0xff]  }
 0x5a9   : > { %2997 = vmatpush3.bf16.msra.mxu0 %v3392_v20 }
 0x5aa   : > { %2998 = vmatprep.subr.bf16.mxu0 %v3393_v18 }
 0x5ad   : > { %2999 = vmatpush3.bf16.msra.mxu0 %v3394_v14 }
 0x5ae   : > { %3000 = vmatprep.subr.bf16.mxu0 %v3395_v19 }
 0x5b1   : > { %3001 = vmatpush3.bf16.msra.mxu0 %v3396_v21 }
 0x5b2   : > { %3002 = vmatprep.subr.bf16.mxu0 %v3397_v22 }
 0x5b5   : > { %3003 = vmatpush3.bf16.msra.mxu0 %v3398_v23 }
 0x5b6   : > { %3004 = vmatprep.subr.bf16.mxu0 %v3399_v25 }
 0x5b9   : > { %3005 = vmatpush3.bf16.msra.mxu0 %v3400_v26 }
 0x5ba   : > { %3006 = vmatprep.subr.bf16.mxu0 %v3401_v47 }
 0x668   : > { %v2108_v50 = vpop.f32.mrf.mxu0 }
 0x669   : > { %v2109_v48 = vadd.f32 %v2884_v49, %v2108_v50  ;;  %v3403_v50 = vld [vmem:[%s4194_s4 + $0x48] sm:$0xff]  }
 0x66a   : > { %v3152_v51 = vpop.f32.mrf.mxu0 }
 0x66b   : > { %v2115_v52 = vadd.f32 %v2109_v48, %v4233_v28  ;;  %v3404_v48 = vld [vmem:[%s4194_s4 + $0x8] sm:$0xff]   ;;  %v3405_v51 = vld [vmem:[%s4194_s4 + $0x40] sm:$0xff]  }
 0x66c   : > { %v2111_v53 = vpop.f32.mrf.mxu0 }
 0x66d   : > { %v2112_v54 = vadd.f32 %v2884_v49, %v2111_v53  ;;  %2119 = vadd.xlane.f32.xlu1 %v2115_v52  ;;  %v3402_v49 = vld [vmem:[%s4194_s4 + $0x10] sm:$0xff]  }
 0x66e   : > { %v3153_v55 = vpop.f32.mrf.mxu0  ;;  %3007 = vmatpush3.bf16.msra.mxu0 %v3402_v49  ;;  %v2175_v53 = vld [vmem:[%s4174_s28] sm:$0x3] }
 0x66f   : > { %v2116_v56 = vadd.f32 %v2112_v54, %v4236_v29  ;;  %3008 = vmatprep.subr.bf16.mxu0 %v3403_v50  ;;  %v2184_v55 = vrot.slane %v2175_v53, %v852_v36 }
 0x671   : > { %2121 = vadd.xlane.f32.xlu0 %v2116_v56 }
 0x672   : > { %3009 = vmatpush3.bf16.msra.mxu0 %v3404_v48 }
 0x673   : > { %3010 = vmatprep.subr.bf16.mxu0 %v3405_v51 }
 0x6f6   : > { %v2120_v59 = vpop.xlane.xlu1 %2119 }
 0x6f7   : > { %v2124_v62 = vmul.f32 0.0078125, %v2120_v59 }
 0x6f9   : > { %v4461_v7 = vsub.f32 %v2115_v52, %v2124_v62  ;;  %v3406_v52 = vld [vmem:[%s4194_s4] sm:$0xff]  }
 0x6fa   : > { %v2122_v28 = vpop.xlane.xlu0 %2121  ;;  %3011 = vmatpush3.bf16.msra.mxu0 %v3406_v52 }
 0x6fb   : > { %v2125_v60 = vmul.f32 0.0078125, %v2122_v28  ;;  %v2128_v29 = vmul.f32 %v4461_v7, %v4461_v7 }
 0x6fd   : > { %v4465_v61 = vsub.f32 %v2116_v56, %v2125_v60  ;;  %2130 = vadd.xlane.f32.xlu0 %v2128_v29  ;;  %v2180_v56 = vrot.slane %v2175_v53, %v848_v37 }
 0x6ff   : > { %v2129_v63 = vmul.f32 %v4465_v61, %v4465_v61 }
 0x701   : > { %2132 = vadd.xlane.f32.xlu1 %v2129_v63 }
 0x786   : > { %v2131_v27 = vpop.xlane.xlu0 %2130 }
 0x787   : > { %v2134_v8 = vmul.f32 0.0078125, %v2131_v27 }
 0x789   : > { %v2136_v30 = vadd.f32 1e-05, %v2134_v8 }
 0x78a   : > { %v2133_v31 = vpop.xlane.xlu1 %2132 }
 0x78b   : > { %3439 = vrsqrt.f32 %v2136_v30  ;;  %v2135_v32 = vmul.f32 0.0078125, %v2133_v31  ;;  %v2928_v30 = vld [vmem:[%s792_s16] ss:$0 sm:$0xff]  ;;  %s4712_s16 = sand.u32 1, %s3745_s17  }
 0x78c   : > { %s4544_s14 = scalar_lea.sflag [#allocation4], %s4712_s16 }
 0x78d   : > { %v2137_v33 = vadd.f32 1e-05, %v2135_v32  ;;  %v2929_v32 = vld [vmem:[%s795_s25] ss:$0 sm:$0xff]  ;;  %s3641_s25 = scalar_lea.vmem %s4539_s29, 256 }
 0x78e   : > { %p3642_p1 = scmp.ne.s32.totalorder %s4539_s29, %s3641_s25  ;;  %p3649_p7 = scmp.lt.s32.totalorder %s3647_s0, %s3641_s25 }
 0x78f   : > { %3441 = vrsqrt.f32 %v2137_v33 }
 0x790   : > { %p3643_p3 = pnand %p3642_p1, %p4713_p13  ;;  %p3650_p6 = por %p3649_p7, %p3648_p0 }
 0x792   : > { %p3644_p2 = pneg %p3643_p3 }
 0x794   : > { %p3651_p11 = pnand %p3650_p6, %p3644_p2 }
 0x798   : > { %v3440_v34 = vpop.eup %3439 }
 0x799   : > { %v2140_v38 = vmul.f32 %v3440_v34, %v4461_v7 }
 0x79b   : > { %v2148_v42 = vmul.f32 %v2893_v39, %v2140_v38 }
 0x79c   : > { %v3442_v24 = vpop.eup %3441 }
 0x79d   : > { %v2141_v40 = vmul.f32 %v3442_v24, %v4465_v61  ;;  %v2156_v41 = vadd.f32 %v2894_v43, %v2148_v42 }
 0x79f   : > { %v2149_v44 = vmul.f32 %v2893_v39, %v2141_v40 }
 0x7a1   : > { %v2157_v45 = vadd.f32 %v2894_v43, %v2149_v44 }
 0x7a3   : > { %v2158_v46 = vpack.c.bf16 %v2157_v45, %v2156_v41 }
 0x7a5   : > { %2300 = vmatmul.mubr.bf16.vlgmr.msra.gmra.mxu1 %v2158_v46 }
 0x865   : > { %v2301_v54 = vpop.f32.mrf.mxu1 }
 0x866   : > { %v2302_v7 = vadd.f32 %v2301_v54, %v2180_v56 }
 0x867   : > { %v2303_v57 = vpop.f32.mrf.mxu1 }
 0x868   : > { %v2304_v59 = vadd.f32 %v2303_v57, %v2184_v55  ;;  %v2310_v0 = vmax.f32 %v2302_v7, 0.0 }
 0x869   : > { %v2305_v58 = vpop.f32.mrf.mxu1 }
 0x86a   : > { %v2306_v62 = vadd.f32 %v2305_v58, %v2180_v56  ;;  %v2311_v61 = vmax.f32 %v2304_v59, 0.0 }
 0x86b   : > { %v2307_v28 = vpop.f32.mrf.mxu1 }
 0x86c   : > { %v2308_v60 = vadd.f32 %v2307_v28, %v2184_v55  ;;  %v2312_v29 = vmax.f32 %v2306_v62, 0.0 }
 0x86e   : > { %v2313_v63 = vmax.f32 %v2308_v60, 0.0  ;;  %v2314_v2 = vpack.c.bf16 %v2312_v29, %v2310_v0 }
 0x870   : > { %v2315_v1 = vpack.c.bf16 %v2313_v63, %v2311_v61 }
 0x872   : > { %2483 = vmatprep.mubr.bf16.mxu0 %v2315_v1 }
 0x873   : > { %2484 = vmatmul.mubr.bf16.vlgmr.msra.gmra.mxu0 %v2314_v2 }
 0x933   : > { %v3012_v36 = vpop.f32.mrf.mxu0 }
 0x935   : > { %v3013_v37 = vpop.f32.mrf.mxu0 }
 0x936   : > { %v3014_v3 = vadd.f32 %v3013_v37, %v3012_v36 }
 0x937   : > { %v3015_v4 = vpop.f32.mrf.mxu0 }
 0x938   : > { %v2486_v5 = vadd.f32 %v3014_v3, %v2911_v35 }
 0x939   : > { %v3016_v6 = vpop.f32.mrf.mxu0 }
 0x93a   : > { %v3017_v9 = vadd.f32 %v3016_v6, %v3015_v4  ;;  %v2492_v10 = vadd.f32 %v2486_v5, %v2156_v41 }
 0x93c   : > { %v2489_v11 = vadd.f32 %v3017_v9, %v2911_v35  ;;  %2496 = vadd.xlane.f32.xlu0 %v2492_v10 }
 0x93e   : > { %v2493_v12 = vadd.f32 %v2489_v11, %v2157_v45 }
 0x940   : > { %2498 = vadd.xlane.f32.xlu1 %v2493_v12 }
 0x9c5   : > { %v2497_v13 = vpop.xlane.xlu0 %2496 }
 0x9c6   : > { %v2500_v15 = vmul.f32 0.0078125, %v2497_v13 }
 0x9c8   : > { %v2502_v16 = vsub.f32 %v2492_v10, %v2500_v15 }
 0x9c9   : > { %v2499_v17 = vpop.xlane.xlu1 %2498 }
 0x9ca   : > { %v2501_v20 = vmul.f32 0.0078125, %v2499_v17  ;;  %v2504_v18 = vmul.f32 %v2502_v16, %v2502_v16 }
 0x9cc   : > { %v2503_v14 = vsub.f32 %v2493_v12, %v2501_v20  ;;  %2506 = vadd.xlane.f32.xlu0 %v2504_v18 }
 0x9ce   : > { %v2505_v19 = vmul.f32 %v2503_v14, %v2503_v14 }
 0x9d0   : > { %2508 = vadd.xlane.f32.xlu1 %v2505_v19 }
 0xa55   : > { %v2507_v21 = vpop.xlane.xlu0 %2506 }
 0xa56   : > { %v2510_v22 = vmul.f32 0.0078125, %v2507_v21 }
 0xa58   : > { %v2512_v23 = vadd.f32 1e-05, %v2510_v22 }
 0xa59   : > { %v2509_v25 = vpop.xlane.xlu1 %2508 }
 0xa5a   : > { %3443 = vrsqrt.f32 %v2512_v23  ;;  %v2511_v26 = vmul.f32 0.0078125, %v2509_v25 }
 0xa5c   : > { %v2513_v27 = vadd.f32 1e-05, %v2511_v26 }
 0xa5e   : > { %3445 = vrsqrt.f32 %v2513_v27 }
 0xa67   : > { %v3444_v8 = vpop.eup %3443 }
 0xa68   : > { %v2516_v31 = vmul.f32 %v3444_v8, %v2502_v16 }
 0xa6a   : > { %v2524_v33 = vmul.f32 %v2928_v30, %v2516_v31 }
 0xa6b   : > { %v3446_v34 = vpop.eup %3445 }
 0xa6c   : > { %v2517_v38 = vmul.f32 %v3446_v34, %v2503_v14  ;;  %v2532_v39 = vadd.f32 %v2929_v32, %v2524_v33 }
 0xa6e   : > { %v2525_v24 = vmul.f32 %v2928_v30, %v2517_v38  ;;  %2534 = vst [vmem:[%s4197_s8] sm:$0xff] %v2532_v39 }
 0xa70   : > { %v2533_v40 = vadd.f32 %v2929_v32, %v2525_v24 }
 0xa72   : > { %2535 = vst [vmem:[%s4197_s8 + $0x8] sm:$0xff] %v2533_v40 }
 0xa73   : > { %3654 = shalt.err (!%p3651_p11)
}
 0xa74   : > { %s3655_s8 = scalar_lea.hbm %s4537_s9, 256  ;;  %s3659_s3 = scalar_lea.hbm %s4711_s6, 512 }
 0xa75   : > { %p3656_p9 = scmp.ne.s32.totalorder %s4537_s9, %s3655_s8  ;;  %p3660_p10 = scmp.lt.s32.totalorder %s4537_s9, %s4711_s6 }
 0xa76   : > { %p3661_p5 = scmp.lt.s32.totalorder %s3659_s3, %s3655_s8 }
 0xa77   : > { %p3657_p12 = pnand %p3656_p9, %p4713_p13 }
 0xa78   : > { %p3662_p8 = por %p3661_p5, %p3660_p10 }
 0xa79   : > { %p3658_p4 = pneg %p3657_p12 }
 0xa7b   : > { %p3663_p1 = pnand %p3662_p8, %p3658_p4 }
 0xa7d   : > { %3666 = shalt.err (!%p3663_p1)
}
 0xa7e   : > { %s3791_s28 = smov 128   ;;  %s3792_s24 = smov 8  }
 0xa7f   : > { %3176 = dma.vmem_to_hbm [thread:$0]  (%p4713_p13), %s4539_s29, 256, %s4537_s9, %s4544_s14, %s3791_s28, %s3791_s28, %s3792_s24  }
 0xa80 PF: > { %s4714_s30 = sld [smem:[#allocation19_spill]]  ;;  %p3208_p3 = scmp.ge.s32.totalorder %s3769_s23, 2 }
 0xa81   : > { %s4715_s20 = sld [smem:[#allocation29_spill]] }
 0xa86   : > { %s2565_s22 = sand.u32 1, %s4714_s30  }
 0xa87   : > { %p4716_p2 = scmp.ne.s32.totalorder %s4715_s20, 0  ;;  %s2566_s15 = scalar_lea.sflag [#allocation4], %s2565_s22 }
 0xa89   : > { %p3202_p0 = pnand %p3208_p3, %p4716_p2 }
 0xa8b   : > { %p3203_p7 = pneg %p3202_p0 }
 0xa8d   : > { %3724 = dma.done.wait (%p3203_p7), %s2566_s15, 256  }
 0xa8e   : > { %3726 = vsyncadd (%p3203_p7), %s2566_s15, 4294967040  ;;  %s31_s23 = sadd.s32 1, %s3769_s23   ;;  %s4717_s29 = sld [smem:[#allocation17_spill]] }
 0xa8f   : > { %p28_p6 = scmp.ge.s32.totalorder %s31_s23, 6   ;;  %s4718_s30 = sld [smem:[#allocation18_spill]] }
 0xa90   : > { %s4719_s15 = sld [smem:[#allocation28_spill]]  ;;  %s4726_s16 = smov %s3745_s17 }
 0xa91   : > { %s4720_s7 = sld [smem:[#allocation20_spill]] }
 0xa92   : > { %s4721_s18 = sld [smem:[#allocation27_spill]] }
 0xa93   : > { %s4722_s19 = sld [smem:[#allocation23_spill]]  ;;  %30 = sbr.rel (!%p28_p6) target bundleno = 26 (0x1a), region = 205 }
 0xa94   : > { %s4723_s20 = sld [smem:[#allocation24_spill]] }
 0xa95   : > { %s4724_s21 = sld [smem:[#allocation25_spill]] }
 0xa96   : > { %s4725_s22 = sld [smem:[#allocation26_spill]] }
 0xa97   : > { %s4727_s17 = smov %s4720_s7 }
 0xa98   :  { %2571 = vsyncpa [#allocation3], 1 }
 0xa99   :  { %2573 = vsyncpa [#allocation3 + $0x1], 1 }
 0xa9a   :  { %2574 = vsyncpa [#allocation6], 1 }
 0xa9b   :  { %2575 = vsyncpa [#allocation4], 1 }
 0xa9c   :  { %2577 = vsyncpa [#allocation4 + $0x1], 1 }

</bundles_post_ra>
